<compile_context>
chip_gen: v6e
topology: v6e:2x2x1
jax: 0.10.0
libtpu: 0.0.40
codegen_flags: <defaults>
</compile_context>

<pallas_src>
import functools
import math

import jax
import jax.numpy as jnp
from jax.experimental import pallas as pl
from jax.experimental.pallas import tpu as pltpu


# ----------------------------- GRU cell helpers (traced inside the kernel) -----------------

def _gru_step_h0(gi_r, gi_z, gi_n, bhh_r, bhh_z, bhh_n):
    """One GRU cell step from h = 0: the h @ W_hh terms vanish, h' = (1 - z) * n."""
    r = jax.nn.sigmoid(gi_r + bhh_r)
    z = jax.nn.sigmoid(gi_z + bhh_z)
    n = jnp.tanh(gi_n + r * bhh_n)
    return (1.0 - z) * n


def _gru_step(gi_r, gi_z, gi_n, h, whh_r, whh_z, whh_n, bhh_r, bhh_z, bhh_n):
    """One GRU cell step; gi_* = x @ W_ih_* + b_ih_* is precomputed (hoisted)."""
    gh_r = jnp.dot(h, whh_r, preferred_element_type=jnp.float32) + bhh_r
    gh_z = jnp.dot(h, whh_z, preferred_element_type=jnp.float32) + bhh_z
    gh_n = jnp.dot(h, whh_n, preferred_element_type=jnp.float32) + bhh_n
    r = jax.nn.sigmoid(gi_r + gh_r)
    z = jax.nn.sigmoid(gi_z + gh_z)
    n = jnp.tanh(gi_n + r * gh_n)
    return (1.0 - z) * n + z * h


# ----------------------------------- fused model kernel ------------------------------------

def fused_model_kernel(
        x_ref,                                            # (T*B, D) time-major, row = t*B + b
        rf_wih_ref, rf_whh_ref, rf_bih_ref, rf_bhh_ref,   # first GRU, forward direction
        rb_wih_ref, rb_bih_ref, rb_bhh_ref,               # first GRU, backward dir (1 step, no W_hh)
        gf_wih_ref, gf_whh_ref, gf_bih_ref, gf_bhh_ref,   # second GRU, forward direction
        gb_wih_ref, gb_whh_ref, gb_bih_ref, gb_bhh_ref,   # second GRU, backward direction
        fc_w_ref, fc_b_ref,                               # final Linear
        out_ref,                                          # (B, output_size)
        *, seq_len):
    T = seq_len
    TB = x_ref.shape[0]
    B = TB // T

    x2d = x_ref[...]                                       # (T*B, D)

    # ---------------- first bidirectional GRU: only out[:, -1, :] is consumed ----------------
    # Forward direction: hoist the input projection for ALL T steps out of the serial loop.
    rf_whh = [rf_whh_ref[g] for g in range(3)]
    rf_bhh = [rf_bhh_ref[g] for g in range(3)]
    gi_all = [jnp.dot(x2d, rf_wih_ref[g], preferred_element_type=jnp.float32) + rf_bih_ref[g]
              for g in range(3)]                           # each (T*B, H1), gates r/z/n

    def gi_at(t):
        return [gi_all[g][t * B:(t + 1) * B, :] for g in range(3)]

    g0 = gi_at(0)                                          # t = 0: h0 = 0 -> no W_hh matmul
    h_f = _gru_step_h0(g0[0], g0[1], g0[2], rf_bhh[0], rf_bhh[1], rf_bhh[2])
    for t in range(1, T):                                  # fully unrolled (T static)
        gt = gi_at(t)
        h_f = _gru_step(gt[0], gt[1], gt[2], h_f,
                        rf_whh[0], rf_whh[1], rf_whh[2],
                        rf_bhh[0], rf_bhh[1], rf_bhh[2])

    # Backward direction: out[:, -1, H1:] is the backward hidden at time T-1, i.e. exactly
    # ONE cell step on x[T-1] from h0 = 0 (the other T-1 steps never influence it).
    x_last = x2d[(T - 1) * B:T * B, :]                     # (B, D)
    gib = [jnp.dot(x_last, rb_wih_ref[g], preferred_element_type=jnp.float32) + rb_bih_ref[g]
           for g in range(3)]
    h_b = _gru_step_h0(gib[0], gib[1], gib[2],
                       rb_bhh_ref[0], rb_bhh_ref[1], rb_bhh_ref[2])

    # nn.Dropout(0.2) is identity in eval mode.
    # TODO(synk): training-mode dropout (random mask) not implemented; inference semantics only.
    last = jnp.concatenate([h_f, h_b], axis=-1)            # (B, 2*H1) == out[:, -1]

    # -------- second bidirectional GRU: PyTorch treats the 2-D input as an UNBATCHED --------
    # -------- sequence of length L = B with feature dim 2*H1.                        --------
    L = B
    gf_whh = [gf_whh_ref[g] for g in range(3)]
    gf_bhh = [gf_bhh_ref[g] for g in range(3)]
    gb_whh = [gb_whh_ref[g] for g in range(3)]
    gb_bhh = [gb_bhh_ref[g] for g in range(3)]

    # Hoisted input projections for both directions (whole sequence at once).
    gif2 = [jnp.dot(last, gf_wih_ref[g], preferred_element_type=jnp.float32) + gf_bih_ref[g]
            for g in range(3)]                             # each (L, H2)
    gib2 = [jnp.dot(last, gb_wih_ref[g], preferred_element_type=jnp.float32) + gb_bih_ref[g]
            for g in range(3)]

    # Forward direction, fully unrolled over L steps.
    outs_f = []
    h = None
    for l in range(L):
        gl = [gif2[g][l:l + 1, :] for g in range(3)]
        if h is None:
            h = _gru_step_h0(gl[0], gl[1], gl[2], gf_bhh[0], gf_bhh[1], gf_bhh[2])
        else:
            h = _gru_step(gl[0], gl[1], gl[2], h,
                          gf_whh[0], gf_whh[1], gf_whh[2],
                          gf_bhh[0], gf_bhh[1], gf_bhh[2])
        outs_f.append(h)

    # Backward direction, fully unrolled (processes l = L-1 .. 0).
    outs_b = [None] * L
    h = None
    for step in range(L):
        l = L - 1 - step
        gl = [gib2[g][l:l + 1, :] for g in range(3)]
        if h is None:
            h = _gru_step_h0(gl[0], gl[1], gl[2], gb_bhh[0], gb_bhh[1], gb_bhh[2])
        else:
            h = _gru_step(gl[0], gl[1], gl[2], h,
                          gb_whh[0], gb_whh[1], gb_whh[2],
                          gb_bhh[0], gb_bhh[1], gb_bhh[2])
        outs_b[l] = h

    out2 = jnp.concatenate([jnp.concatenate(outs_f, axis=0),
                            jnp.concatenate(outs_b, axis=0)], axis=-1)   # (L, 2*H2)

    # ------------------------------ fused final Linear (epilogue) ----------------------------
    logits = (jnp.dot(out2, fc_w_ref[...], preferred_element_type=jnp.float32)
              + fc_b_ref[...])
    out_ref[...] = logits.astype(out_ref.dtype)


# -------------------------------------- wrapper ---------------------------------------------

_VMEM = pl.BlockSpec(memory_space=pltpu.MemorySpace.VMEM)


@jax.jit
def model_wo_cnn_forward(batch, params):
    """batch: (B, T, D) — batch_first input to the base bidirectional GRU."""
    B, T, D = batch.shape
    out_size = params["fc_w"].shape[-1]
    # Time-major + flattened to 2-D (row = t*B + b): the kernel then only does plain 2-D
    # MXU matmuls and static row slices.  This ~1 KiB layout op is the only non-Pallas HLO.
    x2d = jnp.transpose(batch, (1, 0, 2)).reshape(T * B, D)
    rf, rb = params["rnn_fwd"], params["rnn_bwd"]
    gf, gb = params["gru_fwd"], params["gru_bwd"]
    kernel = functools.partial(fused_model_kernel, seq_len=T)
    return pl.pallas_call(
        kernel,
        out_shape=jax.ShapeDtypeStruct((B, out_size), jnp.float32),
        in_specs=[_VMEM] * 18,
        out_specs=_VMEM,
    )(x2d,
      rf["wih"], rf["whh"], rf["bih"], rf["bhh"],
      rb["wih"], rb["bih"], rb["bhh"],
      gf["wih"], gf["whh"], gf["bih"], gf["bhh"],
      gb["wih"], gb["whh"], gb["bih"], gb["bhh"],
      params["fc_w"], params["fc_b"])


# --------------------------- pure-JAX reference (PyTorch semantics) --------------------------

def _ref_gru_cell(x_t, h, p):
    hp = jax.lax.Precision.HIGHEST
    gi = [jnp.dot(x_t, p["wih"][g], precision=hp) + p["bih"][g] for g in range(3)]
    gh = [jnp.dot(h, p["whh"][g], precision=hp) + p["bhh"][g] for g in range(3)]
    r = jax.nn.sigmoid(gi[0] + gh[0])
    z = jax.nn.sigmoid(gi[1] + gh[1])
    n = jnp.tanh(gi[2] + r * gh[2])
    return (1.0 - z) * n + z * h


def _ref_bigru_outputs(xs, p_fwd, p_bwd, hidden):
    """xs: list over time of (N, D) arrays -> list over time of (N, 2*hidden)."""
    n_rows = xs[0].shape[0]
    h = jnp.zeros((n_rows, hidden), jnp.float32)
    outs_f = []
    for x_t in xs:
        h = _ref_gru_cell(x_t, h, p_fwd)
        outs_f.append(h)
    h = jnp.zeros((n_rows, hidden), jnp.float32)
    outs_b_rev = []
    for x_t in xs[::-1]:
        h = _ref_gru_cell(x_t, h, p_bwd)
        outs_b_rev.append(h)
    outs_b = outs_b_rev[::-1]
    return [jnp.concatenate([f, b], axis=-1) for f, b in zip(outs_f, outs_b)]


def reference_forward(batch, params):
    B, T, _ = batch.shape
    H1 = params["rnn_fwd"]["whh"].shape[-1]
    H2 = params["gru_fwd"]["whh"].shape[-1]
    xs = [batch[:, t, :] for t in range(T)]
    out1 = _ref_bigru_outputs(xs, params["rnn_fwd"], params["rnn_bwd"], H1)
    last = out1[-1]                                   # out[:, -1]; dropout = identity (eval)
    seq = [last[l:l + 1, :] for l in range(B)]        # unbatched length-B sequence
    out2 = _ref_bigru_outputs(seq, params["gru_fwd"], params["gru_bwd"], H2)
    out2 = jnp.concatenate(out2, axis=0)              # (B, 2*H2)
    return (jnp.dot(out2, params["fc_w"], precision=jax.lax.Precision.HIGHEST)
            + params["fc_b"])


# ------------------------------------ parameter init -----------------------------------------

def init_gru_dir_params(key, d_in, hidden):
    k1, k2, k3, k4 = jax.random.split(key, 4)
    s = 1.0 / math.sqrt(hidden)
    return {
        "wih": jax.random.uniform(k1, (3, d_in, hidden), jnp.float32, -s, s),
        "whh": jax.random.uniform(k2, (3, hidden, hidden), jnp.float32, -s, s),
        "bih": jax.random.uniform(k3, (3, 1, hidden), jnp.float32, -s, s),
        "bhh": jax.random.uniform(k4, (3, 1, hidden), jnp.float32, -s, s),
    }


def init_params(key, d_in, h1, h2, output_size):
    keys = jax.random.split(key, 6)
    s_fc = 1.0 / math.sqrt(2 * h2)
    return {
        # base (recur_model.rnn): bidirectional GRU, hidden_size = h1
        "rnn_fwd": init_gru_dir_params(keys[0], d_in, h1),
        "rnn_bwd": init_gru_dir_params(keys[1], d_in, h1),
        # self.gru: GRU(input_size=2*h1, hidden_size=h2, bidirectional=True, n_layers=1)
        "gru_fwd": init_gru_dir_params(keys[2], 2 * h1, h2),
        "gru_bwd": init_gru_dir_params(keys[3], 2 * h1, h2),
        # self.fc: Linear(2*h2, output_size)
        "fc_w": jax.random.uniform(keys[4], (2 * h2, output_size), jnp.float32, -s_fc, s_fc),
        "fc_b": jax.random.uniform(keys[5], (1, output_size), jnp.float32, -s_fc, s_fc),
    }


# ------------------------------------------ main ---------------------------------------------

if __name__ == "__main__":
    B, T, D_IN = 2, 8, 16        # batch, seq len, input features
    H1 = 32                      # base rnn hidden size
    H2 = 64                      # Model_wo_CNN default hidden_size
    OUTPUT_SIZE = 4

    root = jax.random.PRNGKey(0)
    k_param, k_x = jax.random.split(root)
    params = init_params(k_param, D_IN, H1, H2, OUTPUT_SIZE)
    batch = jax.random.normal(k_x, (B, T, D_IN), jnp.float32)

    out = jax.block_until_ready(model_wo_cnn_forward(batch, params))
    assert out.shape == (B, OUTPUT_SIZE), out.shape
    assert bool(jnp.all(jnp.isfinite(out)))

    # Validate the fused / last-step-only kernel against a plain-JAX reference that runs
    # both directions of both GRUs for their full length (PyTorch semantics, no shortcuts).
    ref = reference_forward(batch, params)
    max_err = float(jnp.max(jnp.abs(out - ref)))
    assert max_err < 2e-2, f"kernel/reference mismatch: max abs err = {max_err}"

    print("KERNEL_OK")
</pallas_src>

<mosaic_0001>
module attributes {stable_mosaic.version = 11 : i64} {
  func.func @fused_model_kernel(%arg0: memref<16x16xf32, #tpu.memory_space<vmem>>, %arg1: memref<3x16x32xf32, #tpu.memory_space<vmem>>, %arg2: memref<3x32x32xf32, #tpu.memory_space<vmem>>, %arg3: memref<3x1x32xf32, #tpu.memory_space<vmem>>, %arg4: memref<3x1x32xf32, #tpu.memory_space<vmem>>, %arg5: memref<3x16x32xf32, #tpu.memory_space<vmem>>, %arg6: memref<3x1x32xf32, #tpu.memory_space<vmem>>, %arg7: memref<3x1x32xf32, #tpu.memory_space<vmem>>, %arg8: memref<3x64x64xf32, #tpu.memory_space<vmem>>, %arg9: memref<3x64x64xf32, #tpu.memory_space<vmem>>, %arg10: memref<3x1x64xf32, #tpu.memory_space<vmem>>, %arg11: memref<3x1x64xf32, #tpu.memory_space<vmem>>, %arg12: memref<3x64x64xf32, #tpu.memory_space<vmem>>, %arg13: memref<3x64x64xf32, #tpu.memory_space<vmem>>, %arg14: memref<3x1x64xf32, #tpu.memory_space<vmem>>, %arg15: memref<3x1x64xf32, #tpu.memory_space<vmem>>, %arg16: memref<128x4xf32, #tpu.memory_space<vmem>>, %arg17: memref<1x4xf32, #tpu.memory_space<vmem>>, %arg18: memref<2x4xf32, #tpu.memory_space<vmem>>) attributes {dimension_semantics = [], scalar_prefetch = 0 : i64, scratch_operands = 0 : i64, tpu.core_type = #tpu.core_type<tc>} {
    %c0 = arith.constant 0 : index
    %c0_0 = arith.constant 0 : index
    %0 = vector.load %arg0[%c0, %c0_0] : memref<16x16xf32, #tpu.memory_space<vmem>>, vector<16x16xf32>
    %c0_1 = arith.constant 0 : index
    %c0_2 = arith.constant 0 : index
    %c0_3 = arith.constant 0 : index
    %1 = vector.load %arg2[%c0_1, %c0_2, %c0_3] : memref<3x32x32xf32, #tpu.memory_space<vmem>>, vector<1x32x32xf32>
    %2 = vector.shape_cast %1 : vector<1x32x32xf32> to vector<32x32xf32>
    %c1 = arith.constant 1 : index
    %c0_4 = arith.constant 0 : index
    %c0_5 = arith.constant 0 : index
    %3 = vector.load %arg2[%c1, %c0_4, %c0_5] : memref<3x32x32xf32, #tpu.memory_space<vmem>>, vector<1x32x32xf32>
    %4 = vector.shape_cast %3 : vector<1x32x32xf32> to vector<32x32xf32>
    %c2 = arith.constant 2 : index
    %c0_6 = arith.constant 0 : index
    %c0_7 = arith.constant 0 : index
    %5 = vector.load %arg2[%c2, %c0_6, %c0_7] : memref<3x32x32xf32, #tpu.memory_space<vmem>>, vector<1x32x32xf32>
    %6 = vector.shape_cast %5 : vector<1x32x32xf32> to vector<32x32xf32>
    %c0_8 = arith.constant 0 : index
    %c0_9 = arith.constant 0 : index
    %c0_10 = arith.constant 0 : index
    %7 = vector.load %arg4[%c0_8, %c0_9, %c0_10] : memref<3x1x32xf32, #tpu.memory_space<vmem>>, vector<1x1x32xf32>
    %8 = vector.shape_cast %7 : vector<1x1x32xf32> to vector<1x32xf32>
    %c1_11 = arith.constant 1 : index
    %c0_12 = arith.constant 0 : index
    %c0_13 = arith.constant 0 : index
    %9 = vector.load %arg4[%c1_11, %c0_12, %c0_13] : memref<3x1x32xf32, #tpu.memory_space<vmem>>, vector<1x1x32xf32>
    %10 = vector.shape_cast %9 : vector<1x1x32xf32> to vector<1x32xf32>
    %c2_14 = arith.constant 2 : index
    %c0_15 = arith.constant 0 : index
    %c0_16 = arith.constant 0 : index
    %11 = vector.load %arg4[%c2_14, %c0_15, %c0_16] : memref<3x1x32xf32, #tpu.memory_space<vmem>>, vector<1x1x32xf32>
    %12 = vector.shape_cast %11 : vector<1x1x32xf32> to vector<1x32xf32>
    %c0_17 = arith.constant 0 : index
    %c0_18 = arith.constant 0 : index
    %c0_19 = arith.constant 0 : index
    %13 = vector.load %arg1[%c0_17, %c0_18, %c0_19] : memref<3x16x32xf32, #tpu.memory_space<vmem>>, vector<1x16x32xf32>
    %14 = vector.shape_cast %13 : vector<1x16x32xf32> to vector<16x32xf32>
    %cst = arith.constant dense<0.000000e+00> : vector<16x32xf32>
    %15 = tpu.matmul %0, %14, %cst {dimension_numbers = #tpu.dot_dimension_numbers<[1], [0], [0], [1], [0, 0, 1, 1], [], []>} : vector<16x16xf32>, vector<16x32xf32>, vector<16x32xf32> -> vector<16x32xf32>
    %c0_20 = arith.constant 0 : index
    %c0_21 = arith.constant 0 : index
    %c0_22 = arith.constant 0 : index
    %16 = vector.load %arg3[%c0_20, %c0_21, %c0_22] : memref<3x1x32xf32, #tpu.memory_space<vmem>>, vector<1x1x32xf32>
    %17 = vector.shape_cast %16 : vector<1x1x32xf32> to vector<1x32xf32>
    %18 = vector.broadcast %17 : vector<1x32xf32> to vector<16x32xf32>
    %19 = arith.addf %15, %18 : vector<16x32xf32>
    %c1_23 = arith.constant 1 : index
    %c0_24 = arith.constant 0 : index
    %c0_25 = arith.constant 0 : index
    %20 = vector.load %arg1[%c1_23, %c0_24, %c0_25] : memref<3x16x32xf32, #tpu.memory_space<vmem>>, vector<1x16x32xf32>
    %21 = vector.shape_cast %20 : vector<1x16x32xf32> to vector<16x32xf32>
    %cst_26 = arith.constant dense<0.000000e+00> : vector<16x32xf32>
    %22 = tpu.matmul %0, %21, %cst_26 {dimension_numbers = #tpu.dot_dimension_numbers<[1], [0], [0], [1], [0, 0, 1, 1], [], []>} : vector<16x16xf32>, vector<16x32xf32>, vector<16x32xf32> -> vector<16x32xf32>
    %c1_27 = arith.constant 1 : index
    %c0_28 = arith.constant 0 : index
    %c0_29 = arith.constant 0 : index
    %23 = vector.load %arg3[%c1_27, %c0_28, %c0_29] : memref<3x1x32xf32, #tpu.memory_space<vmem>>, vector<1x1x32xf32>
    %24 = vector.shape_cast %23 : vector<1x1x32xf32> to vector<1x32xf32>
    %25 = vector.broadcast %24 : vector<1x32xf32> to vector<16x32xf32>
    %26 = arith.addf %22, %25 : vector<16x32xf32>
    %c2_30 = arith.constant 2 : index
    %c0_31 = arith.constant 0 : index
    %c0_32 = arith.constant 0 : index
    %27 = vector.load %arg1[%c2_30, %c0_31, %c0_32] : memref<3x16x32xf32, #tpu.memory_space<vmem>>, vector<1x16x32xf32>
    %28 = vector.shape_cast %27 : vector<1x16x32xf32> to vector<16x32xf32>
    %cst_33 = arith.constant dense<0.000000e+00> : vector<16x32xf32>
    %29 = tpu.matmul %0, %28, %cst_33 {dimension_numbers = #tpu.dot_dimension_numbers<[1], [0], [0], [1], [0, 0, 1, 1], [], []>} : vector<16x16xf32>, vector<16x32xf32>, vector<16x32xf32> -> vector<16x32xf32>
    %c2_34 = arith.constant 2 : index
    %c0_35 = arith.constant 0 : index
    %c0_36 = arith.constant 0 : index
    %30 = vector.load %arg3[%c2_34, %c0_35, %c0_36] : memref<3x1x32xf32, #tpu.memory_space<vmem>>, vector<1x1x32xf32>
    %31 = vector.shape_cast %30 : vector<1x1x32xf32> to vector<1x32xf32>
    %32 = vector.broadcast %31 : vector<1x32xf32> to vector<16x32xf32>
    %33 = arith.addf %29, %32 : vector<16x32xf32>
    %34 = vector.extract_strided_slice %19 {offsets = [0, 0], sizes = [2, 32], strides = [1, 1]} : vector<16x32xf32> to vector<2x32xf32>
    %35 = vector.extract_strided_slice %26 {offsets = [0, 0], sizes = [2, 32], strides = [1, 1]} : vector<16x32xf32> to vector<2x32xf32>
    %36 = vector.extract_strided_slice %33 {offsets = [0, 0], sizes = [2, 32], strides = [1, 1]} : vector<16x32xf32> to vector<2x32xf32>
    %37 = vector.broadcast %8 : vector<1x32xf32> to vector<2x32xf32>
    %38 = arith.addf %34, %37 : vector<2x32xf32>
    %39 = arith.negf %38 : vector<2x32xf32>
    %40 = math.exp %39 : vector<2x32xf32>
    %cst_37 = arith.constant 1.000000e+00 : f32
    %41 = vector.broadcast %cst_37 : f32 to vector<2x32xf32>
    %42 = arith.addf %41, %40 : vector<2x32xf32>
    %43 = arith.divf %41, %42 : vector<2x32xf32>
    %44 = vector.broadcast %10 : vector<1x32xf32> to vector<2x32xf32>
    %45 = arith.addf %35, %44 : vector<2x32xf32>
    %46 = arith.negf %45 : vector<2x32xf32>
    %47 = math.exp %46 : vector<2x32xf32>
    %cst_38 = arith.constant 1.000000e+00 : f32
    %48 = vector.broadcast %cst_38 : f32 to vector<2x32xf32>
    %49 = arith.addf %48, %47 : vector<2x32xf32>
    %50 = arith.divf %48, %49 : vector<2x32xf32>
    %51 = vector.broadcast %12 : vector<1x32xf32> to vector<2x32xf32>
    %52 = arith.mulf %43, %51 : vector<2x32xf32>
    %53 = arith.addf %36, %52 : vector<2x32xf32>
    %54 = math.tanh %53 : vector<2x32xf32>
    %cst_39 = arith.constant 1.000000e+00 : f32
    %55 = vector.broadcast %cst_39 : f32 to vector<2x32xf32>
    %56 = arith.subf %55, %50 : vector<2x32xf32>
    %57 = arith.mulf %56, %54 : vector<2x32xf32>
    %58 = vector.extract_strided_slice %19 {offsets = [2, 0], sizes = [2, 32], strides = [1, 1]} : vector<16x32xf32> to vector<2x32xf32>
    %59 = vector.extract_strided_slice %26 {offsets = [2, 0], sizes = [2, 32], strides = [1, 1]} : vector<16x32xf32> to vector<2x32xf32>
    %60 = vector.extract_strided_slice %33 {offsets = [2, 0], sizes = [2, 32], strides = [1, 1]} : vector<16x32xf32> to vector<2x32xf32>
    %cst_40 = arith.constant dense<0.000000e+00> : vector<2x32xf32>
    %61 = tpu.matmul %57, %2, %cst_40 {dimension_numbers = #tpu.dot_dimension_numbers<[1], [0], [0], [1], [0, 0, 1, 1], [], []>} : vector<2x32xf32>, vector<32x32xf32>, vector<2x32xf32> -> vector<2x32xf32>
    %62 = vector.broadcast %8 : vector<1x32xf32> to vector<2x32xf32>
    %63 = arith.addf %61, %62 : vector<2x32xf32>
    %cst_41 = arith.constant dense<0.000000e+00> : vector<2x32xf32>
    %64 = tpu.matmul %57, %4, %cst_41 {dimension_numbers = #tpu.dot_dimension_numbers<[1], [0], [0], [1], [0, 0, 1, 1], [], []>} : vector<2x32xf32>, vector<32x32xf32>, vector<2x32xf32> -> vector<2x32xf32>
    %65 = vector.broadcast %10 : vector<1x32xf32> to vector<2x32xf32>
    %66 = arith.addf %64, %65 : vector<2x32xf32>
    %cst_42 = arith.constant dense<0.000000e+00> : vector<2x32xf32>
    %67 = tpu.matmul %57, %6, %cst_42 {dimension_numbers = #tpu.dot_dimension_numbers<[1], [0], [0], [1], [0, 0, 1, 1], [], []>} : vector<2x32xf32>, vector<32x32xf32>, vector<2x32xf32> -> vector<2x32xf32>
    %68 = vector.broadcast %12 : vector<1x32xf32> to vector<2x32xf32>
    %69 = arith.addf %67, %68 : vector<2x32xf32>
    %70 = arith.addf %58, %63 : vector<2x32xf32>
    %71 = arith.negf %70 : vector<2x32xf32>
    %72 = math.exp %71 : vector<2x32xf32>
    %cst_43 = arith.constant 1.000000e+00 : f32
    %73 = vector.broadcast %cst_43 : f32 to vector<2x32xf32>
    %74 = arith.addf %73, %72 : vector<2x32xf32>
    %75 = arith.divf %73, %74 : vector<2x32xf32>
    %76 = arith.addf %59, %66 : vector<2x32xf32>
    %77 = arith.negf %76 : vector<2x32xf32>
    %78 = math.exp %77 : vector<2x32xf32>
    %cst_44 = arith.constant 1.000000e+00 : f32
    %79 = vector.broadcast %cst_44 : f32 to vector<2x32xf32>
    %80 = arith.addf %79, %78 : vector<2x32xf32>
    %81 = arith.divf %79, %80 : vector<2x32xf32>
    %82 = arith.mulf %75, %69 : vector<2x32xf32>
    %83 = arith.addf %60, %82 : vector<2x32xf32>
    %84 = math.tanh %83 : vector<2x32xf32>
    %cst_45 = arith.constant 1.000000e+00 : f32
    %85 = vector.broadcast %cst_45 : f32 to vector<2x32xf32>
    %86 = arith.subf %85, %81 : vector<2x32xf32>
    %87 = arith.mulf %86, %84 : vector<2x32xf32>
    %88 = arith.mulf %81, %57 : vector<2x32xf32>
    %89 = arith.addf %87, %88 : vector<2x32xf32>
    %90 = vector.extract_strided_slice %19 {offsets = [4, 0], sizes = [2, 32], strides = [1, 1]} : vector<16x32xf32> to vector<2x32xf32>
    %91 = vector.extract_strided_slice %26 {offsets = [4, 0], sizes = [2, 32], strides = [1, 1]} : vector<16x32xf32> to vector<2x32xf32>
    %92 = vector.extract_strided_slice %33 {offsets = [4, 0], sizes = [2, 32], strides = [1, 1]} : vector<16x32xf32> to vector<2x32xf32>
    %cst_46 = arith.constant dense<0.000000e+00> : vector<2x32xf32>
    %93 = tpu.matmul %89, %2, %cst_46 {dimension_numbers = #tpu.dot_dimension_numbers<[1], [0], [0], [1], [0, 0, 1, 1], [], []>} : vector<2x32xf32>, vector<32x32xf32>, vector<2x32xf32> -> vector<2x32xf32>
    %94 = vector.broadcast %8 : vector<1x32xf32> to vector<2x32xf32>
    %95 = arith.addf %93, %94 : vector<2x32xf32>
    %cst_47 = arith.constant dense<0.000000e+00> : vector<2x32xf32>
    %96 = tpu.matmul %89, %4, %cst_47 {dimension_numbers = #tpu.dot_dimension_numbers<[1], [0], [0], [1], [0, 0, 1, 1], [], []>} : vector<2x32xf32>, vector<32x32xf32>, vector<2x32xf32> -> vector<2x32xf32>
    %97 = vector.broadcast %10 : vector<1x32xf32> to vector<2x32xf32>
    %98 = arith.addf %96, %97 : vector<2x32xf32>
    %cst_48 = arith.constant dense<0.000000e+00> : vector<2x32xf32>
    %99 = tpu.matmul %89, %6, %cst_48 {dimension_numbers = #tpu.dot_dimension_numbers<[1], [0], [0], [1], [0, 0, 1, 1], [], []>} : vector<2x32xf32>, vector<32x32xf32>, vector<2x32xf32> -> vector<2x32xf32>
    %100 = vector.broadcast %12 : vector<1x32xf32> to vector<2x32xf32>
    %101 = arith.addf %99, %100 : vector<2x32xf32>
    %102 = arith.addf %90, %95 : vector<2x32xf32>
    %103 = arith.negf %102 : vector<2x32xf32>
    %104 = math.exp %103 : vector<2x32xf32>
    %cst_49 = arith.constant 1.000000e+00 : f32
    %105 = vector.broadcast %cst_49 : f32 to vector<2x32xf32>
    %106 = arith.addf %105, %104 : vector<2x32xf32>
    %107 = arith.divf %105, %106 : vector<2x32xf32>
    %108 = arith.addf %91, %98 : vector<2x32xf32>
    %109 = arith.negf %108 : vector<2x32xf32>
    %110 = math.exp %109 : vector<2x32xf32>
    %cst_50 = arith.constant 1.000000e+00 : f32
    %111 = vector.broadcast %cst_50 : f32 to vector<2x32xf32>
    %112 = arith.addf %111, %110 : vector<2x32xf32>
    %113 = arith.divf %111, %112 : vector<2x32xf32>
    %114 = arith.mulf %107, %101 : vector<2x32xf32>
    %115 = arith.addf %92, %114 : vector<2x32xf32>
    %116 = math.tanh %115 : vector<2x32xf32>
    %cst_51 = arith.constant 1.000000e+00 : f32
    %117 = vector.broadcast %cst_51 : f32 to vector<2x32xf32>
    %118 = arith.subf %117, %113 : vector<2x32xf32>
    %119 = arith.mulf %118, %116 : vector<2x32xf32>
    %120 = arith.mulf %113, %89 : vector<2x32xf32>
    %121 = arith.addf %119, %120 : vector<2x32xf32>
    %122 = vector.extract_strided_slice %19 {offsets = [6, 0], sizes = [2, 32], strides = [1, 1]} : vector<16x32xf32> to vector<2x32xf32>
    %123 = vector.extract_strided_slice %26 {offsets = [6, 0], sizes = [2, 32], strides = [1, 1]} : vector<16x32xf32> to vector<2x32xf32>
    %124 = vector.extract_strided_slice %33 {offsets = [6, 0], sizes = [2, 32], strides = [1, 1]} : vector<16x32xf32> to vector<2x32xf32>
    %cst_52 = arith.constant dense<0.000000e+00> : vector<2x32xf32>
    %125 = tpu.matmul %121, %2, %cst_52 {dimension_numbers = #tpu.dot_dimension_numbers<[1], [0], [0], [1], [0, 0, 1, 1], [], []>} : vector<2x32xf32>, vector<32x32xf32>, vector<2x32xf32> -> vector<2x32xf32>
    %126 = vector.broadcast %8 : vector<1x32xf32> to vector<2x32xf32>
    %127 = arith.addf %125, %126 : vector<2x32xf32>
    %cst_53 = arith.constant dense<0.000000e+00> : vector<2x32xf32>
    %128 = tpu.matmul %121, %4, %cst_53 {dimension_numbers = #tpu.dot_dimension_numbers<[1], [0], [0], [1], [0, 0, 1, 1], [], []>} : vector<2x32xf32>, vector<32x32xf32>, vector<2x32xf32> -> vector<2x32xf32>
    %129 = vector.broadcast %10 : vector<1x32xf32> to vector<2x32xf32>
    %130 = arith.addf %128, %129 : vector<2x32xf32>
    %cst_54 = arith.constant dense<0.000000e+00> : vector<2x32xf32>
    %131 = tpu.matmul %121, %6, %cst_54 {dimension_numbers = #tpu.dot_dimension_numbers<[1], [0], [0], [1], [0, 0, 1, 1], [], []>} : vector<2x32xf32>, vector<32x32xf32>, vector<2x32xf32> -> vector<2x32xf32>
    %132 = vector.broadcast %12 : vector<1x32xf32> to vector<2x32xf32>
    %133 = arith.addf %131, %132 : vector<2x32xf32>
    %134 = arith.addf %122, %127 : vector<2x32xf32>
    %135 = arith.negf %134 : vector<2x32xf32>
    %136 = math.exp %135 : vector<2x32xf32>
    %cst_55 = arith.constant 1.000000e+00 : f32
    %137 = vector.broadcast %cst_55 : f32 to vector<2x32xf32>
    %138 = arith.addf %137, %136 : vector<2x32xf32>
    %139 = arith.divf %137, %138 : vector<2x32xf32>
    %140 = arith.addf %123, %130 : vector<2x32xf32>
    %141 = arith.negf %140 : vector<2x32xf32>
    %142 = math.exp %141 : vector<2x32xf32>
    %cst_56 = arith.constant 1.000000e+00 : f32
    %143 = vector.broadcast %cst_56 : f32 to vector<2x32xf32>
    %144 = arith.addf %143, %142 : vector<2x32xf32>
    %145 = arith.divf %143, %144 : vector<2x32xf32>
    %146 = arith.mulf %139, %133 : vector<2x32xf32>
    %147 = arith.addf %124, %146 : vector<2x32xf32>
    %148 = math.tanh %147 : vector<2x32xf32>
    %cst_57 = arith.constant 1.000000e+00 : f32
    %149 = vector.broadcast %cst_57 : f32 to vector<2x32xf32>
    %150 = arith.subf %149, %145 : vector<2x32xf32>
    %151 = arith.mulf %150, %148 : vector<2x32xf32>
    %152 = arith.mulf %145, %121 : vector<2x32xf32>
    %153 = arith.addf %151, %152 : vector<2x32xf32>
    %154 = vector.extract_strided_slice %19 {offsets = [8, 0], sizes = [2, 32], strides = [1, 1]} : vector<16x32xf32> to vector<2x32xf32>
    %155 = vector.extract_strided_slice %26 {offsets = [8, 0], sizes = [2, 32], strides = [1, 1]} : vector<16x32xf32> to vector<2x32xf32>
    %156 = vector.extract_strided_slice %33 {offsets = [8, 0], sizes = [2, 32], strides = [1, 1]} : vector<16x32xf32> to vector<2x32xf32>
    %cst_58 = arith.constant dense<0.000000e+00> : vector<2x32xf32>
    %157 = tpu.matmul %153, %2, %cst_58 {dimension_numbers = #tpu.dot_dimension_numbers<[1], [0], [0], [1], [0, 0, 1, 1], [], []>} : vector<2x32xf32>, vector<32x32xf32>, vector<2x32xf32> -> vector<2x32xf32>
    %158 = vector.broadcast %8 : vector<1x32xf32> to vector<2x32xf32>
    %159 = arith.addf %157, %158 : vector<2x32xf32>
    %cst_59 = arith.constant dense<0.000000e+00> : vector<2x32xf32>
    %160 = tpu.matmul %153, %4, %cst_59 {dimension_numbers = #tpu.dot_dimension_numbers<[1], [0], [0], [1], [0, 0, 1, 1], [], []>} : vector<2x32xf32>, vector<32x32xf32>, vector<2x32xf32> -> vector<2x32xf32>
    %161 = vector.broadcast %10 : vector<1x32xf32> to vector<2x32xf32>
    %162 = arith.addf %160, %161 : vector<2x32xf32>
    %cst_60 = arith.constant dense<0.000000e+00> : vector<2x32xf32>
    %163 = tpu.matmul %153, %6, %cst_60 {dimension_numbers = #tpu.dot_dimension_numbers<[1], [0], [0], [1], [0, 0, 1, 1], [], []>} : vector<2x32xf32>, vector<32x32xf32>, vector<2x32xf32> -> vector<2x32xf32>
    %164 = vector.broadcast %12 : vector<1x32xf32> to vector<2x32xf32>
    %165 = arith.addf %163, %164 : vector<2x32xf32>
    %166 = arith.addf %154, %159 : vector<2x32xf32>
    %167 = arith.negf %166 : vector<2x32xf32>
    %168 = math.exp %167 : vector<2x32xf32>
    %cst_61 = arith.constant 1.000000e+00 : f32
    %169 = vector.broadcast %cst_61 : f32 to vector<2x32xf32>
    %170 = arith.addf %169, %168 : vector<2x32xf32>
    %171 = arith.divf %169, %170 : vector<2x32xf32>
    %172 = arith.addf %155, %162 : vector<2x32xf32>
    %173 = arith.negf %172 : vector<2x32xf32>
    %174 = math.exp %173 : vector<2x32xf32>
    %cst_62 = arith.constant 1.000000e+00 : f32
    %175 = vector.broadcast %cst_62 : f32 to vector<2x32xf32>
    %176 = arith.addf %175, %174 : vector<2x32xf32>
    %177 = arith.divf %175, %176 : vector<2x32xf32>
    %178 = arith.mulf %171, %165 : vector<2x32xf32>
    %179 = arith.addf %156, %178 : vector<2x32xf32>
    %180 = math.tanh %179 : vector<2x32xf32>
    %cst_63 = arith.constant 1.000000e+00 : f32
    %181 = vector.broadcast %cst_63 : f32 to vector<2x32xf32>
    %182 = arith.subf %181, %177 : vector<2x32xf32>
    %183 = arith.mulf %182, %180 : vector<2x32xf32>
    %184 = arith.mulf %177, %153 : vector<2x32xf32>
    %185 = arith.addf %183, %184 : vector<2x32xf32>
    %186 = vector.extract_strided_slice %19 {offsets = [10, 0], sizes = [2, 32], strides = [1, 1]} : vector<16x32xf32> to vector<2x32xf32>
    %187 = vector.extract_strided_slice %26 {offsets = [10, 0], sizes = [2, 32], strides = [1, 1]} : vector<16x32xf32> to vector<2x32xf32>
    %188 = vector.extract_strided_slice %33 {offsets = [10, 0], sizes = [2, 32], strides = [1, 1]} : vector<16x32xf32> to vector<2x32xf32>
    %cst_64 = arith.constant dense<0.000000e+00> : vector<2x32xf32>
    %189 = tpu.matmul %185, %2, %cst_64 {dimension_numbers = #tpu.dot_dimension_numbers<[1], [0], [0], [1], [0, 0, 1, 1], [], []>} : vector<2x32xf32>, vector<32x32xf32>, vector<2x32xf32> -> vector<2x32xf32>
    %190 = vector.broadcast %8 : vector<1x32xf32> to vector<2x32xf32>
    %191 = arith.addf %189, %190 : vector<2x32xf32>
    %cst_65 = arith.constant dense<0.000000e+00> : vector<2x32xf32>
    %192 = tpu.matmul %185, %4, %cst_65 {dimension_numbers = #tpu.dot_dimension_numbers<[1], [0], [0], [1], [0, 0, 1, 1], [], []>} : vector<2x32xf32>, vector<32x32xf32>, vector<2x32xf32> -> vector<2x32xf32>
    %193 = vector.broadcast %10 : vector<1x32xf32> to vector<2x32xf32>
    %194 = arith.addf %192, %193 : vector<2x32xf32>
    %cst_66 = arith.constant dense<0.000000e+00> : vector<2x32xf32>
    %195 = tpu.matmul %185, %6, %cst_66 {dimension_numbers = #tpu.dot_dimension_numbers<[1], [0], [0], [1], [0, 0, 1, 1], [], []>} : vector<2x32xf32>, vector<32x32xf32>, vector<2x32xf32> -> vector<2x32xf32>
    %196 = vector.broadcast %12 : vector<1x32xf32> to vector<2x32xf32>
    %197 = arith.addf %195, %196 : vector<2x32xf32>
    %198 = arith.addf %186, %191 : vector<2x32xf32>
    %199 = arith.negf %198 : vector<2x32xf32>
    %200 = math.exp %199 : vector<2x32xf32>
    %cst_67 = arith.constant 1.000000e+00 : f32
    %201 = vector.broadcast %cst_67 : f32 to vector<2x32xf32>
    %202 = arith.addf %201, %200 : vector<2x32xf32>
    %203 = arith.divf %201, %202 : vector<2x32xf32>
    %204 = arith.addf %187, %194 : vector<2x32xf32>
    %205 = arith.negf %204 : vector<2x32xf32>
    %206 = math.exp %205 : vector<2x32xf32>
    %cst_68 = arith.constant 1.000000e+00 : f32
    %207 = vector.broadcast %cst_68 : f32 to vector<2x32xf32>
    %208 = arith.addf %207, %206 : vector<2x32xf32>
    %209 = arith.divf %207, %208 : vector<2x32xf32>
    %210 = arith.mulf %203, %197 : vector<2x32xf32>
    %211 = arith.addf %188, %210 : vector<2x32xf32>
    %212 = math.tanh %211 : vector<2x32xf32>
    %cst_69 = arith.constant 1.000000e+00 : f32
    %213 = vector.broadcast %cst_69 : f32 to vector<2x32xf32>
    %214 = arith.subf %213, %209 : vector<2x32xf32>
    %215 = arith.mulf %214, %212 : vector<2x32xf32>
    %216 = arith.mulf %209, %185 : vector<2x32xf32>
    %217 = arith.addf %215, %216 : vector<2x32xf32>
    %218 = vector.extract_strided_slice %19 {offsets = [12, 0], sizes = [2, 32], strides = [1, 1]} : vector<16x32xf32> to vector<2x32xf32>
    %219 = vector.extract_strided_slice %26 {offsets = [12, 0], sizes = [2, 32], strides = [1, 1]} : vector<16x32xf32> to vector<2x32xf32>
    %220 = vector.extract_strided_slice %33 {offsets = [12, 0], sizes = [2, 32], strides = [1, 1]} : vector<16x32xf32> to vector<2x32xf32>
    %cst_70 = arith.constant dense<0.000000e+00> : vector<2x32xf32>
    %221 = tpu.matmul %217, %2, %cst_70 {dimension_numbers = #tpu.dot_dimension_numbers<[1], [0], [0], [1], [0, 0, 1, 1], [], []>} : vector<2x32xf32>, vector<32x32xf32>, vector<2x32xf32> -> vector<2x32xf32>
    %222 = vector.broadcast %8 : vector<1x32xf32> to vector<2x32xf32>
    %223 = arith.addf %221, %222 : vector<2x32xf32>
    %cst_71 = arith.constant dense<0.000000e+00> : vector<2x32xf32>
    %224 = tpu.matmul %217, %4, %cst_71 {dimension_numbers = #tpu.dot_dimension_numbers<[1], [0], [0], [1], [0, 0, 1, 1], [], []>} : vector<2x32xf32>, vector<32x32xf32>, vector<2x32xf32> -> vector<2x32xf32>
    %225 = vector.broadcast %10 : vector<1x32xf32> to vector<2x32xf32>
    %226 = arith.addf %224, %225 : vector<2x32xf32>
    %cst_72 = arith.constant dense<0.000000e+00> : vector<2x32xf32>
    %227 = tpu.matmul %217, %6, %cst_72 {dimension_numbers = #tpu.dot_dimension_numbers<[1], [0], [0], [1], [0, 0, 1, 1], [], []>} : vector<2x32xf32>, vector<32x32xf32>, vector<2x32xf32> -> vector<2x32xf32>
    %228 = vector.broadcast %12 : vector<1x32xf32> to vector<2x32xf32>
    %229 = arith.addf %227, %228 : vector<2x32xf32>
    %230 = arith.addf %218, %223 : vector<2x32xf32>
    %231 = arith.negf %230 : vector<2x32xf32>
    %232 = math.exp %231 : vector<2x32xf32>
    %cst_73 = arith.constant 1.000000e+00 : f32
    %233 = vector.broadcast %cst_73 : f32 to vector<2x32xf32>
    %234 = arith.addf %233, %232 : vector<2x32xf32>
    %235 = arith.divf %233, %234 : vector<2x32xf32>
    %236 = arith.addf %219, %226 : vector<2x32xf32>
    %237 = arith.negf %236 : vector<2x32xf32>
    %238 = math.exp %237 : vector<2x32xf32>
    %cst_74 = arith.constant 1.000000e+00 : f32
    %239 = vector.broadcast %cst_74 : f32 to vector<2x32xf32>
    %240 = arith.addf %239, %238 : vector<2x32xf32>
    %241 = arith.divf %239, %240 : vector<2x32xf32>
    %242 = arith.mulf %235, %229 : vector<2x32xf32>
    %243 = arith.addf %220, %242 : vector<2x32xf32>
    %244 = math.tanh %243 : vector<2x32xf32>
    %cst_75 = arith.constant 1.000000e+00 : f32
    %245 = vector.broadcast %cst_75 : f32 to vector<2x32xf32>
    %246 = arith.subf %245, %241 : vector<2x32xf32>
    %247 = arith.mulf %246, %244 : vector<2x32xf32>
    %248 = arith.mulf %241, %217 : vector<2x32xf32>
    %249 = arith.addf %247, %248 : vector<2x32xf32>
    %250 = vector.extract_strided_slice %19 {offsets = [14, 0], sizes = [2, 32], strides = [1, 1]} : vector<16x32xf32> to vector<2x32xf32>
    %251 = vector.extract_strided_slice %26 {offsets = [14, 0], sizes = [2, 32], strides = [1, 1]} : vector<16x32xf32> to vector<2x32xf32>
    %252 = vector.extract_strided_slice %33 {offsets = [14, 0], sizes = [2, 32], strides = [1, 1]} : vector<16x32xf32> to vector<2x32xf32>
    %cst_76 = arith.constant dense<0.000000e+00> : vector<2x32xf32>
    %253 = tpu.matmul %249, %2, %cst_76 {dimension_numbers = #tpu.dot_dimension_numbers<[1], [0], [0], [1], [0, 0, 1, 1], [], []>} : vector<2x32xf32>, vector<32x32xf32>, vector<2x32xf32> -> vector<2x32xf32>
    %254 = vector.broadcast %8 : vector<1x32xf32> to vector<2x32xf32>
    %255 = arith.addf %253, %254 : vector<2x32xf32>
    %cst_77 = arith.constant dense<0.000000e+00> : vector<2x32xf32>
    %256 = tpu.matmul %249, %4, %cst_77 {dimension_numbers = #tpu.dot_dimension_numbers<[1], [0], [0], [1], [0, 0, 1, 1], [], []>} : vector<2x32xf32>, vector<32x32xf32>, vector<2x32xf32> -> vector<2x32xf32>
    %257 = vector.broadcast %10 : vector<1x32xf32> to vector<2x32xf32>
    %258 = arith.addf %256, %257 : vector<2x32xf32>
    %cst_78 = arith.constant dense<0.000000e+00> : vector<2x32xf32>
    %259 = tpu.matmul %249, %6, %cst_78 {dimension_numbers = #tpu.dot_dimension_numbers<[1], [0], [0], [1], [0, 0, 1, 1], [], []>} : vector<2x32xf32>, vector<32x32xf32>, vector<2x32xf32> -> vector<2x32xf32>
    %260 = vector.broadcast %12 : vector<1x32xf32> to vector<2x32xf32>
    %261 = arith.addf %259, %260 : vector<2x32xf32>
    %262 = arith.addf %250, %255 : vector<2x32xf32>
    %263 = arith.negf %262 : vector<2x32xf32>
    %264 = math.exp %263 : vector<2x32xf32>
    %cst_79 = arith.constant 1.000000e+00 : f32
    %265 = vector.broadcast %cst_79 : f32 to vector<2x32xf32>
    %266 = arith.addf %265, %264 : vector<2x32xf32>
    %267 = arith.divf %265, %266 : vector<2x32xf32>
    %268 = arith.addf %251, %258 : vector<2x32xf32>
    %269 = arith.negf %268 : vector<2x32xf32>
    %270 = math.exp %269 : vector<2x32xf32>
    %cst_80 = arith.constant 1.000000e+00 : f32
    %271 = vector.broadcast %cst_80 : f32 to vector<2x32xf32>
    %272 = arith.addf %271, %270 : vector<2x32xf32>
    %273 = arith.divf %271, %272 : vector<2x32xf32>
    %274 = arith.mulf %267, %261 : vector<2x32xf32>
    %275 = arith.addf %252, %274 : vector<2x32xf32>
    %276 = math.tanh %275 : vector<2x32xf32>
    %cst_81 = arith.constant 1.000000e+00 : f32
    %277 = vector.broadcast %cst_81 : f32 to vector<2x32xf32>
    %278 = arith.subf %277, %273 : vector<2x32xf32>
    %279 = arith.mulf %278, %276 : vector<2x32xf32>
    %280 = arith.mulf %273, %249 : vector<2x32xf32>
    %281 = arith.addf %279, %280 : vector<2x32xf32>
    %282 = vector.extract_strided_slice %0 {offsets = [14, 0], sizes = [2, 16], strides = [1, 1]} : vector<16x16xf32> to vector<2x16xf32>
    %c0_82 = arith.constant 0 : index
    %c0_83 = arith.constant 0 : index
    %c0_84 = arith.constant 0 : index
    %283 = vector.load %arg5[%c0_82, %c0_83, %c0_84] : memref<3x16x32xf32, #tpu.memory_space<vmem>>, vector<1x16x32xf32>
    %284 = vector.shape_cast %283 : vector<1x16x32xf32> to vector<16x32xf32>
    %cst_85 = arith.constant dense<0.000000e+00> : vector<2x32xf32>
    %285 = tpu.matmul %282, %284, %cst_85 {dimension_numbers = #tpu.dot_dimension_numbers<[1], [0], [0], [1], [0, 0, 1, 1], [], []>} : vector<2x16xf32>, vector<16x32xf32>, vector<2x32xf32> -> vector<2x32xf32>
    %c0_86 = arith.constant 0 : index
    %c0_87 = arith.constant 0 : index
    %c0_88 = arith.constant 0 : index
    %286 = vector.load %arg6[%c0_86, %c0_87, %c0_88] : memref<3x1x32xf32, #tpu.memory_space<vmem>>, vector<1x1x32xf32>
    %287 = vector.shape_cast %286 : vector<1x1x32xf32> to vector<1x32xf32>
    %288 = vector.broadcast %287 : vector<1x32xf32> to vector<2x32xf32>
    %289 = arith.addf %285, %288 : vector<2x32xf32>
    %c1_89 = arith.constant 1 : index
    %c0_90 = arith.constant 0 : index
    %c0_91 = arith.constant 0 : index
    %290 = vector.load %arg5[%c1_89, %c0_90, %c0_91] : memref<3x16x32xf32, #tpu.memory_space<vmem>>, vector<1x16x32xf32>
    %291 = vector.shape_cast %290 : vector<1x16x32xf32> to vector<16x32xf32>
    %cst_92 = arith.constant dense<0.000000e+00> : vector<2x32xf32>
    %292 = tpu.matmul %282, %291, %cst_92 {dimension_numbers = #tpu.dot_dimension_numbers<[1], [0], [0], [1], [0, 0, 1, 1], [], []>} : vector<2x16xf32>, vector<16x32xf32>, vector<2x32xf32> -> vector<2x32xf32>
    %c1_93 = arith.constant 1 : index
    %c0_94 = arith.constant 0 : index
    %c0_95 = arith.constant 0 : index
    %293 = vector.load %arg6[%c1_93, %c0_94, %c0_95] : memref<3x1x32xf32, #tpu.memory_space<vmem>>, vector<1x1x32xf32>
    %294 = vector.shape_cast %293 : vector<1x1x32xf32> to vector<1x32xf32>
    %295 = vector.broadcast %294 : vector<1x32xf32> to vector<2x32xf32>
    %296 = arith.addf %292, %295 : vector<2x32xf32>
    %c2_96 = arith.constant 2 : index
    %c0_97 = arith.constant 0 : index
    %c0_98 = arith.constant 0 : index
    %297 = vector.load %arg5[%c2_96, %c0_97, %c0_98] : memref<3x16x32xf32, #tpu.memory_space<vmem>>, vector<1x16x32xf32>
    %298 = vector.shape_cast %297 : vector<1x16x32xf32> to vector<16x32xf32>
    %cst_99 = arith.constant dense<0.000000e+00> : vector<2x32xf32>
    %299 = tpu.matmul %282, %298, %cst_99 {dimension_numbers = #tpu.dot_dimension_numbers<[1], [0], [0], [1], [0, 0, 1, 1], [], []>} : vector<2x16xf32>, vector<16x32xf32>, vector<2x32xf32> -> vector<2x32xf32>
    %c2_100 = arith.constant 2 : index
    %c0_101 = arith.constant 0 : index
    %c0_102 = arith.constant 0 : index
    %300 = vector.load %arg6[%c2_100, %c0_101, %c0_102] : memref<3x1x32xf32, #tpu.memory_space<vmem>>, vector<1x1x32xf32>
    %301 = vector.shape_cast %300 : vector<1x1x32xf32> to vector<1x32xf32>
    %302 = vector.broadcast %301 : vector<1x32xf32> to vector<2x32xf32>
    %303 = arith.addf %299, %302 : vector<2x32xf32>
    %c0_103 = arith.constant 0 : index
    %c0_104 = arith.constant 0 : index
    %c0_105 = arith.constant 0 : index
    %304 = vector.load %arg7[%c0_103, %c0_104, %c0_105] : memref<3x1x32xf32, #tpu.memory_space<vmem>>, vector<1x1x32xf32>
    %305 = vector.shape_cast %304 : vector<1x1x32xf32> to vector<1x32xf32>
    %c1_106 = arith.constant 1 : index
    %c0_107 = arith.constant 0 : index
    %c0_108 = arith.constant 0 : index
    %306 = vector.load %arg7[%c1_106, %c0_107, %c0_108] : memref<3x1x32xf32, #tpu.memory_space<vmem>>, vector<1x1x32xf32>
    %307 = vector.shape_cast %306 : vector<1x1x32xf32> to vector<1x32xf32>
    %c2_109 = arith.constant 2 : index
    %c0_110 = arith.constant 0 : index
    %c0_111 = arith.constant 0 : index
    %308 = vector.load %arg7[%c2_109, %c0_110, %c0_111] : memref<3x1x32xf32, #tpu.memory_space<vmem>>, vector<1x1x32xf32>
    %309 = vector.shape_cast %308 : vector<1x1x32xf32> to vector<1x32xf32>
    %310 = vector.broadcast %305 : vector<1x32xf32> to vector<2x32xf32>
    %311 = arith.addf %289, %310 : vector<2x32xf32>
    %312 = arith.negf %311 : vector<2x32xf32>
    %313 = math.exp %312 : vector<2x32xf32>
    %cst_112 = arith.constant 1.000000e+00 : f32
    %314 = vector.broadcast %cst_112 : f32 to vector<2x32xf32>
    %315 = arith.addf %314, %313 : vector<2x32xf32>
    %316 = arith.divf %314, %315 : vector<2x32xf32>
    %317 = vector.broadcast %307 : vector<1x32xf32> to vector<2x32xf32>
    %318 = arith.addf %296, %317 : vector<2x32xf32>
    %319 = arith.negf %318 : vector<2x32xf32>
    %320 = math.exp %319 : vector<2x32xf32>
    %cst_113 = arith.constant 1.000000e+00 : f32
    %321 = vector.broadcast %cst_113 : f32 to vector<2x32xf32>
    %322 = arith.addf %321, %320 : vector<2x32xf32>
    %323 = arith.divf %321, %322 : vector<2x32xf32>
    %324 = vector.broadcast %309 : vector<1x32xf32> to vector<2x32xf32>
    %325 = arith.mulf %316, %324 : vector<2x32xf32>
    %326 = arith.addf %303, %325 : vector<2x32xf32>
    %327 = math.tanh %326 : vector<2x32xf32>
    %cst_114 = arith.constant 1.000000e+00 : f32
    %328 = vector.broadcast %cst_114 : f32 to vector<2x32xf32>
    %329 = arith.subf %328, %323 : vector<2x32xf32>
    %330 = arith.mulf %329, %327 : vector<2x32xf32>
    %331 = tpu.concatenate %281, %330 in 1 : vector<2x32xf32>, vector<2x32xf32> -> vector<2x64xf32>
    %c0_115 = arith.constant 0 : index
    %c0_116 = arith.constant 0 : index
    %c0_117 = arith.constant 0 : index
    %332 = vector.load %arg9[%c0_115, %c0_116, %c0_117] : memref<3x64x64xf32, #tpu.memory_space<vmem>>, vector<1x64x64xf32>
    %333 = vector.shape_cast %332 : vector<1x64x64xf32> to vector<64x64xf32>
    %c1_118 = arith.constant 1 : index
    %c0_119 = arith.constant 0 : index
    %c0_120 = arith.constant 0 : index
    %334 = vector.load %arg9[%c1_118, %c0_119, %c0_120] : memref<3x64x64xf32, #tpu.memory_space<vmem>>, vector<1x64x64xf32>
    %335 = vector.shape_cast %334 : vector<1x64x64xf32> to vector<64x64xf32>
    %c2_121 = arith.constant 2 : index
    %c0_122 = arith.constant 0 : index
    %c0_123 = arith.constant 0 : index
    %336 = vector.load %arg9[%c2_121, %c0_122, %c0_123] : memref<3x64x64xf32, #tpu.memory_space<vmem>>, vector<1x64x64xf32>
    %337 = vector.shape_cast %336 : vector<1x64x64xf32> to vector<64x64xf32>
    %c0_124 = arith.constant 0 : index
    %c0_125 = arith.constant 0 : index
    %c0_126 = arith.constant 0 : index
    %338 = vector.load %arg11[%c0_124, %c0_125, %c0_126] : memref<3x1x64xf32, #tpu.memory_space<vmem>>, vector<1x1x64xf32>
    %339 = vector.shape_cast %338 : vector<1x1x64xf32> to vector<1x64xf32>
    %c1_127 = arith.constant 1 : index
    %c0_128 = arith.constant 0 : index
    %c0_129 = arith.constant 0 : index
    %340 = vector.load %arg11[%c1_127, %c0_128, %c0_129] : memref<3x1x64xf32, #tpu.memory_space<vmem>>, vector<1x1x64xf32>
    %341 = vector.shape_cast %340 : vector<1x1x64xf32> to vector<1x64xf32>
    %c2_130 = arith.constant 2 : index
    %c0_131 = arith.constant 0 : index
    %c0_132 = arith.constant 0 : index
    %342 = vector.load %arg11[%c2_130, %c0_131, %c0_132] : memref<3x1x64xf32, #tpu.memory_space<vmem>>, vector<1x1x64xf32>
    %343 = vector.shape_cast %342 : vector<1x1x64xf32> to vector<1x64xf32>
    %c0_133 = arith.constant 0 : index
    %c0_134 = arith.constant 0 : index
    %c0_135 = arith.constant 0 : index
    %344 = vector.load %arg13[%c0_133, %c0_134, %c0_135] : memref<3x64x64xf32, #tpu.memory_space<vmem>>, vector<1x64x64xf32>
    %345 = vector.shape_cast %344 : vector<1x64x64xf32> to vector<64x64xf32>
    %c1_136 = arith.constant 1 : index
    %c0_137 = arith.constant 0 : index
    %c0_138 = arith.constant 0 : index
    %346 = vector.load %arg13[%c1_136, %c0_137, %c0_138] : memref<3x64x64xf32, #tpu.memory_space<vmem>>, vector<1x64x64xf32>
    %347 = vector.shape_cast %346 : vector<1x64x64xf32> to vector<64x64xf32>
    %c2_139 = arith.constant 2 : index
    %c0_140 = arith.constant 0 : index
    %c0_141 = arith.constant 0 : index
    %348 = vector.load %arg13[%c2_139, %c0_140, %c0_141] : memref<3x64x64xf32, #tpu.memory_space<vmem>>, vector<1x64x64xf32>
    %349 = vector.shape_cast %348 : vector<1x64x64xf32> to vector<64x64xf32>
    %c0_142 = arith.constant 0 : index
    %c0_143 = arith.constant 0 : index
    %c0_144 = arith.constant 0 : index
    %350 = vector.load %arg15[%c0_142, %c0_143, %c0_144] : memref<3x1x64xf32, #tpu.memory_space<vmem>>, vector<1x1x64xf32>
    %351 = vector.shape_cast %350 : vector<1x1x64xf32> to vector<1x64xf32>
    %c1_145 = arith.constant 1 : index
    %c0_146 = arith.constant 0 : index
    %c0_147 = arith.constant 0 : index
    %352 = vector.load %arg15[%c1_145, %c0_146, %c0_147] : memref<3x1x64xf32, #tpu.memory_space<vmem>>, vector<1x1x64xf32>
    %353 = vector.shape_cast %352 : vector<1x1x64xf32> to vector<1x64xf32>
    %c2_148 = arith.constant 2 : index
    %c0_149 = arith.constant 0 : index
    %c0_150 = arith.constant 0 : index
    %354 = vector.load %arg15[%c2_148, %c0_149, %c0_150] : memref<3x1x64xf32, #tpu.memory_space<vmem>>, vector<1x1x64xf32>
    %355 = vector.shape_cast %354 : vector<1x1x64xf32> to vector<1x64xf32>
    %c0_151 = arith.constant 0 : index
    %c0_152 = arith.constant 0 : index
    %c0_153 = arith.constant 0 : index
    %356 = vector.load %arg8[%c0_151, %c0_152, %c0_153] : memref<3x64x64xf32, #tpu.memory_space<vmem>>, vector<1x64x64xf32>
    %357 = vector.shape_cast %356 : vector<1x64x64xf32> to vector<64x64xf32>
    %cst_154 = arith.constant dense<0.000000e+00> : vector<2x64xf32>
    %358 = tpu.matmul %331, %357, %cst_154 {dimension_numbers = #tpu.dot_dimension_numbers<[1], [0], [0], [1], [0, 0, 1, 1], [], []>} : vector<2x64xf32>, vector<64x64xf32>, vector<2x64xf32> -> vector<2x64xf32>
    %c0_155 = arith.constant 0 : index
    %c0_156 = arith.constant 0 : index
    %c0_157 = arith.constant 0 : index
    %359 = vector.load %arg10[%c0_155, %c0_156, %c0_157] : memref<3x1x64xf32, #tpu.memory_space<vmem>>, vector<1x1x64xf32>
    %360 = vector.shape_cast %359 : vector<1x1x64xf32> to vector<1x64xf32>
    %361 = vector.broadcast %360 : vector<1x64xf32> to vector<2x64xf32>
    %362 = arith.addf %358, %361 : vector<2x64xf32>
    %c1_158 = arith.constant 1 : index
    %c0_159 = arith.constant 0 : index
    %c0_160 = arith.constant 0 : index
    %363 = vector.load %arg8[%c1_158, %c0_159, %c0_160] : memref<3x64x64xf32, #tpu.memory_space<vmem>>, vector<1x64x64xf32>
    %364 = vector.shape_cast %363 : vector<1x64x64xf32> to vector<64x64xf32>
    %cst_161 = arith.constant dense<0.000000e+00> : vector<2x64xf32>
    %365 = tpu.matmul %331, %364, %cst_161 {dimension_numbers = #tpu.dot_dimension_numbers<[1], [0], [0], [1], [0, 0, 1, 1], [], []>} : vector<2x64xf32>, vector<64x64xf32>, vector<2x64xf32> -> vector<2x64xf32>
    %c1_162 = arith.constant 1 : index
    %c0_163 = arith.constant 0 : index
    %c0_164 = arith.constant 0 : index
    %366 = vector.load %arg10[%c1_162, %c0_163, %c0_164] : memref<3x1x64xf32, #tpu.memory_space<vmem>>, vector<1x1x64xf32>
    %367 = vector.shape_cast %366 : vector<1x1x64xf32> to vector<1x64xf32>
    %368 = vector.broadcast %367 : vector<1x64xf32> to vector<2x64xf32>
    %369 = arith.addf %365, %368 : vector<2x64xf32>
    %c2_165 = arith.constant 2 : index
    %c0_166 = arith.constant 0 : index
    %c0_167 = arith.constant 0 : index
    %370 = vector.load %arg8[%c2_165, %c0_166, %c0_167] : memref<3x64x64xf32, #tpu.memory_space<vmem>>, vector<1x64x64xf32>
    %371 = vector.shape_cast %370 : vector<1x64x64xf32> to vector<64x64xf32>
    %cst_168 = arith.constant dense<0.000000e+00> : vector<2x64xf32>
    %372 = tpu.matmul %331, %371, %cst_168 {dimension_numbers = #tpu.dot_dimension_numbers<[1], [0], [0], [1], [0, 0, 1, 1], [], []>} : vector<2x64xf32>, vector<64x64xf32>, vector<2x64xf32> -> vector<2x64xf32>
    %c2_169 = arith.constant 2 : index
    %c0_170 = arith.constant 0 : index
    %c0_171 = arith.constant 0 : index
    %373 = vector.load %arg10[%c2_169, %c0_170, %c0_171] : memref<3x1x64xf32, #tpu.memory_space<vmem>>, vector<1x1x64xf32>
    %374 = vector.shape_cast %373 : vector<1x1x64xf32> to vector<1x64xf32>
    %375 = vector.broadcast %374 : vector<1x64xf32> to vector<2x64xf32>
    %376 = arith.addf %372, %375 : vector<2x64xf32>
    %c0_172 = arith.constant 0 : index
    %c0_173 = arith.constant 0 : index
    %c0_174 = arith.constant 0 : index
    %377 = vector.load %arg12[%c0_172, %c0_173, %c0_174] : memref<3x64x64xf32, #tpu.memory_space<vmem>>, vector<1x64x64xf32>
    %378 = vector.shape_cast %377 : vector<1x64x64xf32> to vector<64x64xf32>
    %cst_175 = arith.constant dense<0.000000e+00> : vector<2x64xf32>
    %379 = tpu.matmul %331, %378, %cst_175 {dimension_numbers = #tpu.dot_dimension_numbers<[1], [0], [0], [1], [0, 0, 1, 1], [], []>} : vector<2x64xf32>, vector<64x64xf32>, vector<2x64xf32> -> vector<2x64xf32>
    %c0_176 = arith.constant 0 : index
    %c0_177 = arith.constant 0 : index
    %c0_178 = arith.constant 0 : index
    %380 = vector.load %arg14[%c0_176, %c0_177, %c0_178] : memref<3x1x64xf32, #tpu.memory_space<vmem>>, vector<1x1x64xf32>
    %381 = vector.shape_cast %380 : vector<1x1x64xf32> to vector<1x64xf32>
    %382 = vector.broadcast %381 : vector<1x64xf32> to vector<2x64xf32>
    %383 = arith.addf %379, %382 : vector<2x64xf32>
    %c1_179 = arith.constant 1 : index
    %c0_180 = arith.constant 0 : index
    %c0_181 = arith.constant 0 : index
    %384 = vector.load %arg12[%c1_179, %c0_180, %c0_181] : memref<3x64x64xf32, #tpu.memory_space<vmem>>, vector<1x64x64xf32>
    %385 = vector.shape_cast %384 : vector<1x64x64xf32> to vector<64x64xf32>
    %cst_182 = arith.constant dense<0.000000e+00> : vector<2x64xf32>
    %386 = tpu.matmul %331, %385, %cst_182 {dimension_numbers = #tpu.dot_dimension_numbers<[1], [0], [0], [1], [0, 0, 1, 1], [], []>} : vector<2x64xf32>, vector<64x64xf32>, vector<2x64xf32> -> vector<2x64xf32>
    %c1_183 = arith.constant 1 : index
    %c0_184 = arith.constant 0 : index
    %c0_185 = arith.constant 0 : index
    %387 = vector.load %arg14[%c1_183, %c0_184, %c0_185] : memref<3x1x64xf32, #tpu.memory_space<vmem>>, vector<1x1x64xf32>
    %388 = vector.shape_cast %387 : vector<1x1x64xf32> to vector<1x64xf32>
    %389 = vector.broadcast %388 : vector<1x64xf32> to vector<2x64xf32>
    %390 = arith.addf %386, %389 : vector<2x64xf32>
    %c2_186 = arith.constant 2 : index
    %c0_187 = arith.constant 0 : index
    %c0_188 = arith.constant 0 : index
    %391 = vector.load %arg12[%c2_186, %c0_187, %c0_188] : memref<3x64x64xf32, #tpu.memory_space<vmem>>, vector<1x64x64xf32>
    %392 = vector.shape_cast %391 : vector<1x64x64xf32> to vector<64x64xf32>
    %cst_189 = arith.constant dense<0.000000e+00> : vector<2x64xf32>
    %393 = tpu.matmul %331, %392, %cst_189 {dimension_numbers = #tpu.dot_dimension_numbers<[1], [0], [0], [1], [0, 0, 1, 1], [], []>} : vector<2x64xf32>, vector<64x64xf32>, vector<2x64xf32> -> vector<2x64xf32>
    %c2_190 = arith.constant 2 : index
    %c0_191 = arith.constant 0 : index
    %c0_192 = arith.constant 0 : index
    %394 = vector.load %arg14[%c2_190, %c0_191, %c0_192] : memref<3x1x64xf32, #tpu.memory_space<vmem>>, vector<1x1x64xf32>
    %395 = vector.shape_cast %394 : vector<1x1x64xf32> to vector<1x64xf32>
    %396 = vector.broadcast %395 : vector<1x64xf32> to vector<2x64xf32>
    %397 = arith.addf %393, %396 : vector<2x64xf32>
    %398 = vector.extract_strided_slice %362 {offsets = [0, 0], sizes = [1, 64], strides = [1, 1]} : vector<2x64xf32> to vector<1x64xf32>
    %399 = vector.extract_strided_slice %369 {offsets = [0, 0], sizes = [1, 64], strides = [1, 1]} : vector<2x64xf32> to vector<1x64xf32>
    %400 = vector.extract_strided_slice %376 {offsets = [0, 0], sizes = [1, 64], strides = [1, 1]} : vector<2x64xf32> to vector<1x64xf32>
    %401 = arith.addf %398, %339 : vector<1x64xf32>
    %402 = arith.negf %401 : vector<1x64xf32>
    %403 = math.exp %402 : vector<1x64xf32>
    %cst_193 = arith.constant 1.000000e+00 : f32
    %404 = vector.broadcast %cst_193 : f32 to vector<1x64xf32>
    %405 = arith.addf %404, %403 : vector<1x64xf32>
    %406 = arith.divf %404, %405 : vector<1x64xf32>
    %407 = arith.addf %399, %341 : vector<1x64xf32>
    %408 = arith.negf %407 : vector<1x64xf32>
    %409 = math.exp %408 : vector<1x64xf32>
    %cst_194 = arith.constant 1.000000e+00 : f32
    %410 = vector.broadcast %cst_194 : f32 to vector<1x64xf32>
    %411 = arith.addf %410, %409 : vector<1x64xf32>
    %412 = arith.divf %410, %411 : vector<1x64xf32>
    %413 = arith.mulf %406, %343 : vector<1x64xf32>
    %414 = arith.addf %400, %413 : vector<1x64xf32>
    %415 = math.tanh %414 : vector<1x64xf32>
    %cst_195 = arith.constant 1.000000e+00 : f32
    %416 = vector.broadcast %cst_195 : f32 to vector<1x64xf32>
    %417 = arith.subf %416, %412 : vector<1x64xf32>
    %418 = arith.mulf %417, %415 : vector<1x64xf32>
    %419 = vector.extract_strided_slice %362 {offsets = [1, 0], sizes = [1, 64], strides = [1, 1]} : vector<2x64xf32> to vector<1x64xf32>
    %420 = vector.extract_strided_slice %369 {offsets = [1, 0], sizes = [1, 64], strides = [1, 1]} : vector<2x64xf32> to vector<1x64xf32>
    %421 = vector.extract_strided_slice %376 {offsets = [1, 0], sizes = [1, 64], strides = [1, 1]} : vector<2x64xf32> to vector<1x64xf32>
    %cst_196 = arith.constant dense<0.000000e+00> : vector<1x64xf32>
    %422 = tpu.matmul %418, %333, %cst_196 {dimension_numbers = #tpu.dot_dimension_numbers<[1], [0], [0], [1], [0, 0, 1, 1], [], []>} : vector<1x64xf32>, vector<64x64xf32>, vector<1x64xf32> -> vector<1x64xf32>
    %423 = arith.addf %422, %339 : vector<1x64xf32>
    %cst_197 = arith.constant dense<0.000000e+00> : vector<1x64xf32>
    %424 = tpu.matmul %418, %335, %cst_197 {dimension_numbers = #tpu.dot_dimension_numbers<[1], [0], [0], [1], [0, 0, 1, 1], [], []>} : vector<1x64xf32>, vector<64x64xf32>, vector<1x64xf32> -> vector<1x64xf32>
    %425 = arith.addf %424, %341 : vector<1x64xf32>
    %cst_198 = arith.constant dense<0.000000e+00> : vector<1x64xf32>
    %426 = tpu.matmul %418, %337, %cst_198 {dimension_numbers = #tpu.dot_dimension_numbers<[1], [0], [0], [1], [0, 0, 1, 1], [], []>} : vector<1x64xf32>, vector<64x64xf32>, vector<1x64xf32> -> vector<1x64xf32>
    %427 = arith.addf %426, %343 : vector<1x64xf32>
    %428 = arith.addf %419, %423 : vector<1x64xf32>
    %429 = arith.negf %428 : vector<1x64xf32>
    %430 = math.exp %429 : vector<1x64xf32>
    %cst_199 = arith.constant 1.000000e+00 : f32
    %431 = vector.broadcast %cst_199 : f32 to vector<1x64xf32>
    %432 = arith.addf %431, %430 : vector<1x64xf32>
    %433 = arith.divf %431, %432 : vector<1x64xf32>
    %434 = arith.addf %420, %425 : vector<1x64xf32>
    %435 = arith.negf %434 : vector<1x64xf32>
    %436 = math.exp %435 : vector<1x64xf32>
    %cst_200 = arith.constant 1.000000e+00 : f32
    %437 = vector.broadcast %cst_200 : f32 to vector<1x64xf32>
    %438 = arith.addf %437, %436 : vector<1x64xf32>
    %439 = arith.divf %437, %438 : vector<1x64xf32>
    %440 = arith.mulf %433, %427 : vector<1x64xf32>
    %441 = arith.addf %421, %440 : vector<1x64xf32>
    %442 = math.tanh %441 : vector<1x64xf32>
    %cst_201 = arith.constant 1.000000e+00 : f32
    %443 = vector.broadcast %cst_201 : f32 to vector<1x64xf32>
    %444 = arith.subf %443, %439 : vector<1x64xf32>
    %445 = arith.mulf %444, %442 : vector<1x64xf32>
    %446 = arith.mulf %439, %418 : vector<1x64xf32>
    %447 = arith.addf %445, %446 : vector<1x64xf32>
    %448 = vector.extract_strided_slice %383 {offsets = [1, 0], sizes = [1, 64], strides = [1, 1]} : vector<2x64xf32> to vector<1x64xf32>
    %449 = vector.extract_strided_slice %390 {offsets = [1, 0], sizes = [1, 64], strides = [1, 1]} : vector<2x64xf32> to vector<1x64xf32>
    %450 = vector.extract_strided_slice %397 {offsets = [1, 0], sizes = [1, 64], strides = [1, 1]} : vector<2x64xf32> to vector<1x64xf32>
    %451 = arith.addf %448, %351 : vector<1x64xf32>
    %452 = arith.negf %451 : vector<1x64xf32>
    %453 = math.exp %452 : vector<1x64xf32>
    %cst_202 = arith.constant 1.000000e+00 : f32
    %454 = vector.broadcast %cst_202 : f32 to vector<1x64xf32>
    %455 = arith.addf %454, %453 : vector<1x64xf32>
    %456 = arith.divf %454, %455 : vector<1x64xf32>
    %457 = arith.addf %449, %353 : vector<1x64xf32>
    %458 = arith.negf %457 : vector<1x64xf32>
    %459 = math.exp %458 : vector<1x64xf32>
    %cst_203 = arith.constant 1.000000e+00 : f32
    %460 = vector.broadcast %cst_203 : f32 to vector<1x64xf32>
    %461 = arith.addf %460, %459 : vector<1x64xf32>
    %462 = arith.divf %460, %461 : vector<1x64xf32>
    %463 = arith.mulf %456, %355 : vector<1x64xf32>
    %464 = arith.addf %450, %463 : vector<1x64xf32>
    %465 = math.tanh %464 : vector<1x64xf32>
    %cst_204 = arith.constant 1.000000e+00 : f32
    %466 = vector.broadcast %cst_204 : f32 to vector<1x64xf32>
    %467 = arith.subf %466, %462 : vector<1x64xf32>
    %468 = arith.mulf %467, %465 : vector<1x64xf32>
    %469 = vector.extract_strided_slice %383 {offsets = [0, 0], sizes = [1, 64], strides = [1, 1]} : vector<2x64xf32> to vector<1x64xf32>
    %470 = vector.extract_strided_slice %390 {offsets = [0, 0], sizes = [1, 64], strides = [1, 1]} : vector<2x64xf32> to vector<1x64xf32>
    %471 = vector.extract_strided_slice %397 {offsets = [0, 0], sizes = [1, 64], strides = [1, 1]} : vector<2x64xf32> to vector<1x64xf32>
    %cst_205 = arith.constant dense<0.000000e+00> : vector<1x64xf32>
    %472 = tpu.matmul %468, %345, %cst_205 {dimension_numbers = #tpu.dot_dimension_numbers<[1], [0], [0], [1], [0, 0, 1, 1], [], []>} : vector<1x64xf32>, vector<64x64xf32>, vector<1x64xf32> -> vector<1x64xf32>
    %473 = arith.addf %472, %351 : vector<1x64xf32>
    %cst_206 = arith.constant dense<0.000000e+00> : vector<1x64xf32>
    %474 = tpu.matmul %468, %347, %cst_206 {dimension_numbers = #tpu.dot_dimension_numbers<[1], [0], [0], [1], [0, 0, 1, 1], [], []>} : vector<1x64xf32>, vector<64x64xf32>, vector<1x64xf32> -> vector<1x64xf32>
    %475 = arith.addf %474, %353 : vector<1x64xf32>
    %cst_207 = arith.constant dense<0.000000e+00> : vector<1x64xf32>
    %476 = tpu.matmul %468, %349, %cst_207 {dimension_numbers = #tpu.dot_dimension_numbers<[1], [0], [0], [1], [0, 0, 1, 1], [], []>} : vector<1x64xf32>, vector<64x64xf32>, vector<1x64xf32> -> vector<1x64xf32>
    %477 = arith.addf %476, %355 : vector<1x64xf32>
    %478 = arith.addf %469, %473 : vector<1x64xf32>
    %479 = arith.negf %478 : vector<1x64xf32>
    %480 = math.exp %479 : vector<1x64xf32>
    %cst_208 = arith.constant 1.000000e+00 : f32
    %481 = vector.broadcast %cst_208 : f32 to vector<1x64xf32>
    %482 = arith.addf %481, %480 : vector<1x64xf32>
    %483 = arith.divf %481, %482 : vector<1x64xf32>
    %484 = arith.addf %470, %475 : vector<1x64xf32>
    %485 = arith.negf %484 : vector<1x64xf32>
    %486 = math.exp %485 : vector<1x64xf32>
    %cst_209 = arith.constant 1.000000e+00 : f32
    %487 = vector.broadcast %cst_209 : f32 to vector<1x64xf32>
    %488 = arith.addf %487, %486 : vector<1x64xf32>
    %489 = arith.divf %487, %488 : vector<1x64xf32>
    %490 = arith.mulf %483, %477 : vector<1x64xf32>
    %491 = arith.addf %471, %490 : vector<1x64xf32>
    %492 = math.tanh %491 : vector<1x64xf32>
    %cst_210 = arith.constant 1.000000e+00 : f32
    %493 = vector.broadcast %cst_210 : f32 to vector<1x64xf32>
    %494 = arith.subf %493, %489 : vector<1x64xf32>
    %495 = arith.mulf %494, %492 : vector<1x64xf32>
    %496 = arith.mulf %489, %468 : vector<1x64xf32>
    %497 = arith.addf %495, %496 : vector<1x64xf32>
    %498 = tpu.concatenate %418, %447 in 0 : vector<1x64xf32>, vector<1x64xf32> -> vector<2x64xf32>
    %499 = tpu.concatenate %497, %468 in 0 : vector<1x64xf32>, vector<1x64xf32> -> vector<2x64xf32>
    %500 = tpu.concatenate %498, %499 in 1 : vector<2x64xf32>, vector<2x64xf32> -> vector<2x128xf32>
    %c0_211 = arith.constant 0 : index
    %c0_212 = arith.constant 0 : index
    %501 = vector.load %arg16[%c0_211, %c0_212] : memref<128x4xf32, #tpu.memory_space<vmem>>, vector<128x4xf32>
    %cst_213 = arith.constant dense<0.000000e+00> : vector<2x4xf32>
    %502 = tpu.matmul %500, %501, %cst_213 {dimension_numbers = #tpu.dot_dimension_numbers<[1], [0], [0], [1], [0, 0, 1, 1], [], []>} : vector<2x128xf32>, vector<128x4xf32>, vector<2x4xf32> -> vector<2x4xf32>
    %c0_214 = arith.constant 0 : index
    %c0_215 = arith.constant 0 : index
    %503 = vector.load %arg17[%c0_214, %c0_215] : memref<1x4xf32, #tpu.memory_space<vmem>>, vector<1x4xf32>
    %504 = vector.broadcast %503 : vector<1x4xf32> to vector<2x4xf32>
    %505 = arith.addf %502, %504 : vector<2x4xf32>
    %c0_216 = arith.constant 0 : index
    %c0_217 = arith.constant 0 : index
    %506 = vector.load %arg18[%c0_216, %c0_217] : memref<2x4xf32, #tpu.memory_space<vmem>>, vector<2x4xf32>
    tpu.vector_store %arg18[%c0_216, %c0_217], %505 {strides = array<i32>} : memref<2x4xf32, #tpu.memory_space<vmem>>, vector<2x4xf32>,
    return
  }
}

</mosaic_0001>

<bundles_post_ra>
// kernel: model_wo_cnn_forward.1
= control target key start
LH: loop header
LB: loop body
LE: loop exit
PB: predicated region body
PF: predicated region fallthrough
CT: control target
= control target key end

     0   :  { %s5806_s0 = inlined_call_operand.vmem [shape: f32[16,16], index: 0, kind: input, shape index: {}]   ;;  %s5807_s1 = inlined_call_operand.vmem [shape: f32[3,16,32], index: 1, kind: input, shape index: {}]   ;;  %s5808_s2 = inlined_call_operand.vmem [shape: f32[3,32,32], index: 2, kind: input, shape index: {}]   ;;  %s5809_s3 = inlined_call_operand.vmem [shape: f32[3,1,32], index: 3, kind: input, shape index: {}]   ;;  %s5810_s4 = inlined_call_operand.vmem [shape: f32[3,1,32], index: 4, kind: input, shape index: {}]   ;;  %s5811_s5 = inlined_call_operand.hbm [shape: f32[3,16,32], index: 5, kind: input, shape index: {}]   ;;  %s5812_s6 = inlined_call_operand.vmem [shape: f32[3,1,32], index: 6, kind: input, shape index: {}]   ;;  %s5813_s7 = inlined_call_operand.vmem [shape: f32[3,1,32], index: 7, kind: input, shape index: {}]   ;;  %s5814_s8 = inlined_call_operand.hbm [shape: f32[3,64,64], index: 8, kind: input, shape index: {}]   ;;  %s5815_s9 = inlined_call_operand.hbm [shape: f32[3,64,64], index: 9, kind: input, shape index: {}]   ;;  %s5816_s10 = inlined_call_operand.vmem [shape: f32[3,1,64], index: 10, kind: input, shape index: {}]   ;;  %s5817_s11 = inlined_call_operand.vmem [shape: f32[3,1,64], index: 11, kind: input, shape index: {}]   ;;  %s5818_s12 = inlined_call_operand.hbm [shape: f32[3,64,64], index: 12, kind: input, shape index: {}]   ;;  %s5819_s13 = inlined_call_operand.hbm [shape: f32[3,64,64], index: 13, kind: input, shape index: {}]   ;;  %s5820_s14 = inlined_call_operand.vmem [shape: f32[3,1,64], index: 14, kind: input, shape index: {}]   ;;  %s5821_s15 = inlined_call_operand.vmem [shape: f32[3,1,64], index: 15, kind: input, shape index: {}]   ;;  %s5822_s16 = inlined_call_operand.vmem [shape: f32[128,4], index: 16, kind: input, shape index: {}]   ;;  %s5823_s17 = inlined_call_operand.vmem [shape: f32[1,4], index: 17, kind: input, shape index: {}]   ;;  %s5824_s18 = inlined_call_operand.hbm [shape: f32[2,4], index: 18, kind: output, shape index: {}]  }
   0x1   :  { %5828 = sst [smem:[#allocation16_spill]] %s5806_s0 }
   0x2   :  { %5829 = sst [smem:[#allocation17_spill]] %s5807_s1 }
   0x3   :  { %5830 = sst [smem:[#allocation18_spill]] %s5808_s2 }
   0x4   :  { %23 = vsyncpa [#allocation3], 0 }
   0x5   :  { %24 = vsyncpa [#allocation6], 0 }
   0x6   :  { %25 = vsyncpa [#allocation9], 0 }
   0x7   :  { %26 = vsyncpa [#allocation4], 0  ;;  %s4868_s27 = smov [#allocation5]   ;;  %s4869_s29 = smov [#allocation8]  }
   0x8   :  { %s58_s28 = sshll.u32 %s4868_s27, 4  ;;  %s86_s30 = sshll.u32 %s4869_s29, 4  ;;  %s59_s28 = int_to_ptr.vmem [resolvable:$true] %s58_s28  ;;  %s87_s30 = int_to_ptr.vmem [resolvable:$true] %s86_s30 }
   0x9   :  { %s4748_s0 = scalar_lea.vmem %s59_s28, 3072  ;;  %p4753_p1 = scmp.lt.s32.totalorder %s59_s28, %s59_s28 }
   0xa   :  { %p4749_p0 = scmp.ne.s32.totalorder %s59_s28, %s4748_s0  ;;  %p4754_p2 = scmp.lt.s32.totalorder %s4748_s0, %s4748_s0 }
   0xc   :  { %p4755_p3 = por %p4754_p2, %p4753_p1 }
   0xe   :  { %p4756_p4 = pnand %p4755_p3, %p4749_p0 }
  0x10   :  { %4759 = shalt.err (!%p4756_p4)
}
  0x11   :  { %s4870_s19 = smov 128   ;;  %s4871_s1 = smov 8  }
  0x12   :  { %64 = dma.hbm_to_vmem [thread:$0]  %s5814_s8, 3072, %s59_s28, [#allocation6], %s4870_s19, %s4870_s19, %s4871_s1  }
  0x13   :  { %s4768_s22 = scalar_lea.vmem %s87_s30, 3072  ;;  %p4773_p6 = scmp.lt.s32.totalorder %s87_s30, %s87_s30 }
  0x14   :  { %p4769_p5 = scmp.ne.s32.totalorder %s87_s30, %s4768_s22  ;;  %p4774_p7 = scmp.lt.s32.totalorder %s4768_s22, %s4768_s22 }
  0x16   :  { %p4775_p8 = por %p4774_p7, %p4773_p6 }
  0x18   :  { %p4776_p9 = pnand %p4775_p8, %p4769_p5 }
  0x1a   :  { %4779 = shalt.err (!%p4776_p9)
}
  0x1b   :  { %92 = dma.hbm_to_vmem [thread:$0]  %s5818_s12, 3072, %s87_s30, [#allocation9], %s4870_s19, %s4870_s19, %s4871_s1  }
  0x1c   :  { %s4872_s24 = smov [#allocation2]   ;;  %s4873_s26 = smov [#allocation7]  }
  0x1d   :  { %s42_s25 = sshll.u32 %s4872_s24, 4  ;;  %s70_s27 = sshll.u32 %s4873_s26, 4  ;;  %s43_s25 = int_to_ptr.vmem [resolvable:$true] %s42_s25  ;;  %s71_s27 = int_to_ptr.vmem [resolvable:$true] %s70_s27 }
  0x1e   :  { %s4788_s8 = scalar_lea.vmem %s43_s25, 768  ;;  %p4793_p11 = scmp.lt.s32.totalorder %s43_s25, %s43_s25 }
  0x1f   :  { %p4789_p10 = scmp.ne.s32.totalorder %s43_s25, %s4788_s8  ;;  %p4794_p12 = scmp.lt.s32.totalorder %s4788_s8, %s4788_s8 }
  0x21   :  { %p4795_p13 = por %p4794_p12, %p4793_p11 }
  0x23   :  { %p4796_p0 = pnand %p4795_p13, %p4789_p10 }
  0x25   :  { %4799 = shalt.err (!%p4796_p0)
}
  0x26   :  { %48 = dma.hbm_to_vmem [thread:$0]  %s5811_s5, 768, %s43_s25, [#allocation3], %s4870_s19, %s4870_s19, %s4871_s1  }
  0x27   :  { %s4808_s12 = scalar_lea.vmem %s71_s27, 3072  ;;  %p4813_p2 = scmp.lt.s32.totalorder %s71_s27, %s71_s27 }
  0x28   :  { %p4809_p1 = scmp.ne.s32.totalorder %s71_s27, %s4808_s12  ;;  %p4814_p3 = scmp.lt.s32.totalorder %s4808_s12, %s4808_s12 }
  0x2a   :  { %p4815_p4 = por %p4814_p3, %p4813_p2 }
  0x2c   :  { %p4816_p5 = pnand %p4815_p4, %p4809_p1 }
  0x2e   :  { %4819 = shalt.err (!%p4816_p5)
}
  0x2f   :  { %76 = dma.hbm_to_vmem [thread:$0]  %s5815_s9, 3072, %s71_s27, [#allocation6], %s4870_s19, %s4870_s19, %s4871_s1  }
  0x30   :  { %s4874_s20 = smov [#allocation10]  }
  0x31   :  { %s98_s21 = sshll.u32 %s4874_s20, 4  ;;  %s99_s21 = int_to_ptr.vmem [resolvable:$true] %s98_s21 }
  0x32   :  { %s4828_s22 = scalar_lea.vmem %s99_s21, 3072  ;;  %p4833_p7 = scmp.lt.s32.totalorder %s99_s21, %s99_s21 }
  0x33   :  { %p4829_p6 = scmp.ne.s32.totalorder %s99_s21, %s4828_s22  ;;  %p4834_p8 = scmp.lt.s32.totalorder %s4828_s22, %s4828_s22 }
  0x35   :  { %p4835_p9 = por %p4834_p8, %p4833_p7 }
  0x37   :  { %p4836_p10 = pnand %p4835_p9, %p4829_p6 }
  0x39   :  { %4839 = shalt.err (!%p4836_p10)
}
  0x3a   :  { %104 = dma.hbm_to_vmem [thread:$0]  %s5819_s13, 3072, %s99_s21, [#allocation9], %s4870_s19, %s4870_s19, %s4871_s1  }
  0x3b   :  { %4860 = dma.done.wait [#allocation3], 768  }
  0x3c   :  { %4861 = vsyncadd [#allocation3], 4294966528 }
  0x3d   :  { %4862 = dma.done.wait [#allocation6], 6144  }
  0x3e   :  { %4863 = vsyncadd [#allocation6], 4294961152 }
  0x3f   :  { %4864 = dma.done.wait [#allocation9], 6144  }
  0x40   :  { %4865 = vsyncadd [#allocation9], 4294961152  ;;  %vm158_vm0 = vcmask 130048   ;;  %s5831_s24 = sld [smem:[#allocation17_spill]]  ;;  %v4875_v10 = vmov 0.0   ;;  %vm4876_vm1 = vmmov 0  }
  0x41   :  { %s5832_s28 = sld [smem:[#allocation16_spill]]  ;;  %v3704_v17 = vld [vmem:[%s5809_s3] ss:$0 sm:$0xff]  ;;  %v3710_v19 = vld [vmem:[%s5809_s3 + $0x1] ss:$0 sm:$0xff]  ;;  %vm449_vm2 = vcmask 261120  }
  0x42   :  { %s5833_s9 = sld [smem:[#allocation18_spill]]  ;;  %v5113_v21 = vld [vmem:[%s5810_s4] ss:$0 sm:$0xff]  ;;  %v3716_v26 = vld [vmem:[%s5809_s3 + $0x2] ss:$0 sm:$0xff]  ;;  %vm2531_vm3 = vcmask 523264  }
  0x43   :  { %v5131_v33 = vld [vmem:[%s5810_s4 + $0x1] ss:$0 sm:$0xff]  ;;  %v5138_v40 = vld [vmem:[%s5810_s4 + $0x2] ss:$0 sm:$0xff]  ;;  %vm3574_vm4 = vcmask 1040384   ;;  %vm3675_vm5 = vcmask 25600  }
  0x46   :  { %v150_v0 = vld [vmem:[%s5831_s24 + $0x8] sm:$0xff]  ;;  %v149_v1 = vld [vmem:[%s5831_s24] sm:$0xff]  ;;  %v3708_v3 = vld [vmem:[%s5831_s24 + $0x18] sm:$0xff] }
  0x47   :  { %v128_v2 = vld [vmem:[%s5832_s28] sm:$0xff]  ;;  %4060 = vmatprep.subr.mxu0 %v150_v0  ;;  %v3707_v4 = vld [vmem:[%s5831_s24 + $0x10] sm:$0xff]  ;;  %v5024_v5 = vld [vmem:[%s5832_s28 + $0x8] sm:$0xff]  ;;  %4067 = vmatprep.subr.mxu1 %v3708_v3 }
  0x48   :  { %4064 = vmatprep.mubr.msk.f32.mxu0 %vm158_vm0, %v128_v2  ;;  %4061 = vmatpush3.msra.mxu0 %v150_v0  ;;  %v3714_v6 = vld [vmem:[%s5831_s24 + $0x28] sm:$0xff]  ;;  %v3713_v7 = vld [vmem:[%s5831_s24 + $0x20] sm:$0xff]  ;;  %v5043_v8 = vld [vmem:[%s5833_s9 + $0x18] sm:$0xff] }
  0x49   :  { %4062 = vmatprep.subr.mxu0 %v149_v1  ;;  %4068 = vmatpush3.msra.mxu1 %v3708_v3  ;;  %v5048_v9 = vld [vmem:[%s5833_s9 + $0x38] sm:$0xff]  ;;  %v5055_v11 = vld [vmem:[%s5833_s9 + $0x10] sm:$0xff]  ;;  %v5069_v13 = vld [vmem:[%s5833_s9 + $0x8] sm:$0xff] }
  0x4a   :  { %4063 = vmatpush3.msra.mxu0 %v149_v1  ;;  %4069 = vmatprep.subr.mxu1 %v3707_v4  ;;  %v5060_v12 = vld [vmem:[%s5833_s9 + $0x30] sm:$0xff]  ;;  %v5074_v14 = vld [vmem:[%s5833_s9 + $0x28] sm:$0xff]  ;;  %v5083_v15 = vld [vmem:[%s5833_s9] sm:$0xff] }
  0x4b   :  { %4065 = vmatmul.mubr.msk.f32.vlgmr.msra.gmra.mxu0 %vm158_vm0, %v5024_v5  ;;  %4070 = vmatpush3.msra.mxu1 %v3707_v4  ;;  %v5090_v16 = vld [vmem:[%s5833_s9 + $0x20] sm:$0xff]  ;;  %v5149_v50 = vld [vmem:[%s5833_s9 + $0x58] sm:$0xff]  ;;  %v5158_v51 = vld [vmem:[%s5833_s9 + $0x50] sm:$0xff] }
  0x4c   :  { %4071 = vmatprep.mubr.msk.f32.mxu1 %vm158_vm0, %v128_v2  ;;  %4074 = vmatprep.subr.mxu0 %v3714_v6  ;;  %v5167_v52 = vld [vmem:[%s5833_s9 + $0x48] sm:$0xff]  ;;  %v5176_v53 = vld [vmem:[%s5833_s9 + $0x40] sm:$0xff] }
  0x4d   :  { %4072 = vmatmul.mubr.msk.f32.vlgmr.msra.gmra.mxu1 %vm158_vm0, %v5024_v5  ;;  %4075 = vmatpush3.msra.mxu0 %v3714_v6 }
  0x4e   :  { %4076 = vmatprep.subr.mxu0 %v3713_v7  ;;  %4078 = vmatprep.mubr.msk.f32.mxu0 %vm158_vm0, %v128_v2 }
  0x4f   :  { %4077 = vmatpush3.msra.mxu0 %v3713_v7  ;;  %4081 = vmatprep.subr.mxu1 %v4875_v10 }
  0x50   :  { %4079 = vmatmul.mubr.msk.f32.vlgmr.msra.gmra.mxu0 %vm158_vm0, %v5024_v5  ;;  %4092 = vmatprep.subr.mxu0 %v4875_v10 }
  0x51   :  { %4082 = vmatpush3.msra.mxu1 %v5043_v8  ;;  %4093 = vmatpush3.msra.mxu0 %v5048_v9 }
  0x52   :  { %4083 = vmatprep.subr.mxu1 %v4875_v10  ;;  %4094 = vmatprep.subr.mxu0 %v4875_v10 }
  0x53   :  { %4084 = vmatpush3.msra.mxu1 %v5055_v11  ;;  %4095 = vmatpush3.msra.mxu0 %v5060_v12 }
  0x54   :  { %4085 = vmatprep.subr.mxu1 %v4875_v10  ;;  %4096 = vmatprep.subr.mxu0 %v4875_v10 }
  0x55   :  { %4086 = vmatpush3.msra.mxu1 %v5069_v13  ;;  %4097 = vmatpush3.msra.mxu0 %v5074_v14 }
  0x56   :  { %4087 = vmatprep.subr.mxu1 %v4875_v10  ;;  %4098 = vmatprep.subr.mxu0 %v4875_v10 }
  0x57   :  { %4088 = vmatpush3.msra.mxu1 %v5083_v15  ;;  %4089 = vmatprep.mubr.msk.f32.mxu1 %vm4876_vm1, %v4875_v10 }
  0x58   :  { %4099 = vmatpush3.msra.mxu0 %v5090_v16  ;;  %4100 = vmatprep.mubr.msk.f32.mxu0 %vm4876_vm1, %v4875_v10 }
  0x59   :  { %4103 = vmatprep.subr.mxu1 %v4875_v10  ;;  %4114 = vmatprep.subr.mxu0 %v4875_v10 }
 0x10b   :  { %v4066_v18 = vpop.f32.mrf.mxu0 }
 0x10c   :  { %v5108_v20 = vadd.f32 %v4066_v18, %v3704_v17 }
 0x10d   :  { %v231_v22 = vpop.f32.mrf.mxu0  ;;  %v4073_v23 = vpop.f32.mrf.mxu1 }
 0x10e   :  { %v5115_v24 = vadd.f32 %v3704_v17, %v231_v22  ;;  %v5117_v25 = vadd.f32 %v4073_v23, %v3710_v19 }
 0x10f   :  { %v317_v27 = vpop.f32.mrf.mxu1 }
 0x110   :  { %v418_v28 = vadd.f32 %v5113_v21, %v5115_v24  ;;  %v4080_v29 = vpop.f32.mrf.mxu0  ;;  %v5126_v32 = vadd.f32 %v3710_v19, %v317_v27 }
 0x111   :  { %v5124_v30 = vadd.f32 %v4080_v29, %v3716_v26 }
 0x112   :  { %v3720_v31 = vmul.f32 -1.442695, %v418_v28  ;;  %v431_v34 = vadd.f32 %v5131_v33, %v5126_v32  ;;  %v403_v41 = vpop.f32.mrf.mxu0 }
 0x113   :  { %v5140_v43 = vadd.f32 %v3716_v26, %v403_v41 }
 0x114   :  { %4608 = vpow2.f32 %v3720_v31  ;;  %v3722_v35 = vmul.f32 -1.442695, %v431_v34 }
 0x116   :  { %4610 = vpow2.f32 %v3722_v35 }
 0x121   :  { %v4609_v36 = vpop.eup %4608 }
 0x122   :  { %v422_v37 = vadd.f32 1.0, %v4609_v36 }
 0x123   :  { %v4611_v38 = vpop.eup %4610 }
 0x124   :  { %4612 = vrcp.f32 %v422_v37  ;;  %v435_v39 = vadd.f32 1.0, %v4611_v38 }
 0x126   :  { %4614 = vrcp.f32 %v435_v39 }
 0x131   :  { %v4613_v42 = vpop.eup %4612 }
 0x132   :  { %v444_v44 = vmul.f32 %v4613_v42, %v5138_v40 }
 0x133   :  { %v4615_v46 = vpop.eup %4614 }
 0x134   :  { %v445_v45 = vadd.f32 %v444_v44, %v5140_v43  ;;  %v447_v47 = vsub.f32 1.0, %v4615_v46 }
 0x136   :  { %4616 = vtanh.f32 %v445_v45 }
 0x143   :  { %v4617_v48 = vpop.eup %4616 }
 0x144   :  { %v5144_v49 = vmul.f32 %v4617_v48, %v447_v47 }
 0x146   :  { %4090 = vmatmul.mubr.msk.f32.vlgmr.msra.gmra.mxu1 %vm449_vm2, %v5144_v49  ;;  %4101 = vmatmul.mubr.msk.f32.vlgmr.msra.gmra.mxu0 %vm449_vm2, %v5144_v49  ;;  %v691_v29 = vrot.slane %v5144_v49, 6 }
 0x147   :  { %4104 = vmatpush3.msra.mxu1 %v5149_v50  ;;  %4111 = vmatprep.mubr.msk.f32.mxu1 %vm4876_vm1, %v4875_v10 }
 0x148   :  { %4105 = vmatprep.subr.mxu1 %v4875_v10  ;;  %4115 = vmatpush3.msra.mxu0 %v5043_v8 }
 0x149   :  { %4106 = vmatpush3.msra.mxu1 %v5158_v51  ;;  %4116 = vmatprep.subr.mxu0 %v4875_v10 }
 0x14a   :  { %4107 = vmatprep.subr.mxu1 %v4875_v10  ;;  %4117 = vmatpush3.msra.mxu0 %v5055_v11 }
 0x14b   :  { %4108 = vmatpush3.msra.mxu1 %v5167_v52  ;;  %4118 = vmatprep.subr.mxu0 %v4875_v10 }
 0x14c   :  { %4109 = vmatprep.subr.mxu1 %v4875_v10  ;;  %4119 = vmatpush3.msra.mxu0 %v5069_v13 }
 0x14d   :  { %4110 = vmatpush3.msra.mxu1 %v5176_v53  ;;  %4120 = vmatprep.subr.mxu0 %v4875_v10 }
 0x14e   :  { %4112 = vmatmul.mubr.msk.f32.vlgmr.msra.gmra.mxu1 %vm449_vm2, %v5144_v49  ;;  %4125 = vmatprep.subr.mxu1 %v4875_v10 }
 0x14f   :  { %4126 = vmatpush3.msra.mxu1 %v5048_v9  ;;  %4121 = vmatpush3.msra.mxu0 %v5083_v15 }
 0x150   :  { %4127 = vmatprep.subr.mxu1 %v4875_v10  ;;  %4122 = vmatprep.mubr.msk.f32.mxu0 %vm4876_vm1, %v4875_v10 }
 0x151   :  { %4128 = vmatpush3.msra.mxu1 %v5060_v12  ;;  %4133 = vmatprep.mubr.msk.f32.mxu1 %vm4876_vm1, %v4875_v10 }
 0x152   :  { %4129 = vmatprep.subr.mxu1 %v4875_v10  ;;  %4136 = vmatprep.subr.mxu0 %v4875_v10 }
 0x153   :  { %4130 = vmatpush3.msra.mxu1 %v5074_v14 }
 0x154   :  { %4131 = vmatprep.subr.mxu1 %v4875_v10 }
 0x155   :  { %4132 = vmatpush3.msra.mxu1 %v5090_v16 }
 0x156   :  { %4147 = vmatprep.subr.mxu1 %v4875_v10 }
 0x206   :  { %v519_v54 = vpop.f32.mrf.mxu1  ;;  %v589_v55 = vpop.f32.mrf.mxu0 }
 0x207   :  { %v520_v56 = vadd.f32 %v5113_v21, %v519_v54  ;;  %v590_v60 = vadd.f32 %v5131_v33, %v589_v55 }
 0x208   :  { %v4091_v57 = vpop.f32.mrf.mxu1  ;;  %v4102_v58 = vpop.f32.mrf.mxu0 }
 0x209   :  { %v664_v59 = vrot.slane %v520_v56, 6  ;;  %v674_v63 = vrot.slane %v590_v60, 6 }
 0x20b   :  { %v666_v61 = vadd.f32 %v664_v59, %v5115_v24  ;;  %v676_v2 = vadd.f32 %v674_v63, %v5126_v32 }
 0x20d   :  { %v3727_v62 = vmul.f32 -1.442695, %v666_v61  ;;  %v3728_v3 = vmul.f32 -1.442695, %v676_v2 }
 0x20e   :  { %v659_v0 = vpop.f32.mrf.mxu1 }
 0x20f   :  { %4618 = vpow2.f32 %v3727_v62  ;;  %v660_v17 = vadd.f32 %v5138_v40, %v659_v0 }
 0x210   :  { %v4113_v1 = vpop.f32.mrf.mxu1  ;;  %4620 = vpow2.f32 %v3728_v3 }
 0x211   :  { %v684_v19 = vrot.slane %v660_v17, 6 }
 0x21c   :  { %v4619_v4 = vpop.eup %4618 }
 0x21d   :  { %v670_v6 = vadd.f32 1.0, %v4619_v4  ;;  %v4621_v7 = vpop.eup %4620 }
 0x21e   :  { %v680_v18 = vadd.f32 1.0, %v4621_v7 }
 0x21f   :  { %4622 = vrcp.f32 %v670_v6 }
 0x220   :  { %4624 = vrcp.f32 %v680_v18 }
 0x22c   :  { %v4623_v22 = vpop.eup %4622 }
 0x22d   :  { %v686_v23 = vmul.f32 %v4623_v22, %v684_v19  ;;  %v4625_v27 = vpop.eup %4624 }
 0x22e   :  { %v689_v28 = vsub.f32 1.0, %v4625_v27  ;;  %v693_v35 = vmul.f32 %v4625_v27, %v691_v29 }
 0x22f   :  { %v687_v26 = vadd.f32 %v686_v23, %v5140_v43 }
 0x231   :  { %4626 = vtanh.f32 %v687_v26 }
 0x23e   :  { %v4627_v31 = vpop.eup %4626 }
 0x23f   :  { %v690_v34 = vmul.f32 %v4627_v31, %v689_v28 }
 0x241   :  { %v5209_v36 = vadd.f32 %v693_v35, %v690_v34 }
 0x243   :  { %v696_v37 = vrot.slane %v5209_v36, 2  ;;  %v937_v4 = vrot.slane %v5209_v36, 6 }
 0x245   :  { %4123 = vmatmul.mubr.msk.f32.vlgmr.msra.gmra.mxu0 %vm449_vm2, %v696_v37  ;;  %4134 = vmatmul.mubr.msk.f32.vlgmr.msra.gmra.mxu1 %vm449_vm2, %v696_v37 }
 0x246   :  { %4137 = vmatpush3.msra.mxu0 %v5149_v50  ;;  %4144 = vmatprep.mubr.msk.f32.mxu0 %vm4876_vm1, %v4875_v10 }
 0x247   :  { %4138 = vmatprep.subr.mxu0 %v4875_v10  ;;  %4148 = vmatpush3.msra.mxu1 %v5043_v8 }
 0x248   :  { %4139 = vmatpush3.msra.mxu0 %v5158_v51  ;;  %4149 = vmatprep.subr.mxu1 %v4875_v10 }
 0x249   :  { %4140 = vmatprep.subr.mxu0 %v4875_v10  ;;  %4150 = vmatpush3.msra.mxu1 %v5055_v11 }
 0x24a   :  { %4141 = vmatpush3.msra.mxu0 %v5167_v52  ;;  %4151 = vmatprep.subr.mxu1 %v4875_v10 }
 0x24b   :  { %4142 = vmatprep.subr.mxu0 %v4875_v10  ;;  %4152 = vmatpush3.msra.mxu1 %v5069_v13 }
 0x24c   :  { %4143 = vmatpush3.msra.mxu0 %v5176_v53  ;;  %4153 = vmatprep.subr.mxu1 %v4875_v10 }
 0x24d   :  { %4145 = vmatmul.mubr.msk.f32.vlgmr.msra.gmra.mxu0 %vm449_vm2, %v696_v37  ;;  %4158 = vmatprep.subr.mxu0 %v4875_v10 }
 0x24e   :  { %4159 = vmatpush3.msra.mxu0 %v5048_v9  ;;  %4154 = vmatpush3.msra.mxu1 %v5083_v15 }
 0x24f   :  { %4160 = vmatprep.subr.mxu0 %v4875_v10  ;;  %4155 = vmatprep.mubr.msk.f32.mxu1 %vm4876_vm1, %v4875_v10 }
 0x250   :  { %4161 = vmatpush3.msra.mxu0 %v5060_v12  ;;  %4166 = vmatprep.mubr.msk.f32.mxu0 %vm4876_vm1, %v4875_v10 }
 0x251   :  { %4162 = vmatprep.subr.mxu0 %v4875_v10  ;;  %4169 = vmatprep.subr.mxu1 %v4875_v10 }
 0x252   :  { %4163 = vmatpush3.msra.mxu0 %v5074_v14 }
 0x253   :  { %4164 = vmatprep.subr.mxu0 %v4875_v10 }
 0x254   :  { %4165 = vmatpush3.msra.mxu0 %v5090_v16 }
 0x255   :  { %4180 = vmatprep.subr.mxu0 %v4875_v10 }
 0x305   :  { %v765_v38 = vpop.f32.mrf.mxu0  ;;  %v835_v39 = vpop.f32.mrf.mxu1 }
 0x306   :  { %v766_v41 = vadd.f32 %v5113_v21, %v765_v38  ;;  %v836_v46 = vadd.f32 %v5131_v33, %v835_v39 }
 0x307   :  { %v4124_v42 = vpop.f32.mrf.mxu0  ;;  %v4135_v44 = vpop.f32.mrf.mxu1 }
 0x308   :  { %v910_v45 = vrot.slane %v766_v41, 4  ;;  %v920_v49 = vrot.slane %v836_v46, 4 }
 0x30a   :  { %v912_v47 = vadd.f32 %v910_v45, %v5115_v24  ;;  %v922_v56 = vadd.f32 %v920_v49, %v5126_v32 }
 0x30c   :  { %v3732_v48 = vmul.f32 -1.442695, %v912_v47  ;;  %v3733_v57 = vmul.f32 -1.442695, %v922_v56 }
 0x30d   :  { %v905_v54 = vpop.f32.mrf.mxu0 }
 0x30e   :  { %4628 = vpow2.f32 %v3732_v48  ;;  %v906_v61 = vadd.f32 %v5138_v40, %v905_v54 }
 0x30f   :  { %v4146_v55 = vpop.f32.mrf.mxu0  ;;  %4630 = vpow2.f32 %v3733_v57 }
 0x310   :  { %v930_v63 = vrot.slane %v906_v61, 4 }
 0x31b   :  { %v4629_v58 = vpop.eup %4628 }
 0x31c   :  { %v916_v59 = vadd.f32 1.0, %v4629_v58  ;;  %v4631_v60 = vpop.eup %4630 }
 0x31d   :  { %v926_v62 = vadd.f32 1.0, %v4631_v60 }
 0x31e   :  { %4632 = vrcp.f32 %v916_v59 }
 0x31f   :  { %4634 = vrcp.f32 %v926_v62 }
 0x32b   :  { %v4633_v0 = vpop.eup %4632 }
 0x32c   :  { %v932_v1 = vmul.f32 %v4633_v0, %v930_v63  ;;  %v4635_v3 = vpop.eup %4634 }
 0x32d   :  { %v935_v6 = vsub.f32 1.0, %v4635_v3  ;;  %v939_v18 = vmul.f32 %v4635_v3, %v937_v4 }
 0x32e   :  { %v933_v2 = vadd.f32 %v932_v1, %v5140_v43 }
 0x330   :  { %4636 = vtanh.f32 %v933_v2 }
 0x33d   :  { %v4637_v7 = vpop.eup %4636 }
 0x33e   :  { %v936_v17 = vmul.f32 %v4637_v7, %v935_v6 }
 0x340   :  { %v5252_v19 = vadd.f32 %v939_v18, %v936_v17 }
 0x342   :  { %v942_v22 = vrot.slane %v5252_v19, 4  ;;  %v1183_v57 = vrot.slane %v5252_v19, 6 }
 0x344   :  { %4156 = vmatmul.mubr.msk.f32.vlgmr.msra.gmra.mxu1 %vm449_vm2, %v942_v22  ;;  %4167 = vmatmul.mubr.msk.f32.vlgmr.msra.gmra.mxu0 %vm449_vm2, %v942_v22 }
 0x345   :  { %4170 = vmatpush3.msra.mxu1 %v5149_v50  ;;  %4177 = vmatprep.mubr.msk.f32.mxu1 %vm4876_vm1, %v4875_v10 }
 0x346   :  { %4171 = vmatprep.subr.mxu1 %v4875_v10  ;;  %4181 = vmatpush3.msra.mxu0 %v5043_v8 }
 0x347   :  { %4172 = vmatpush3.msra.mxu1 %v5158_v51  ;;  %4182 = vmatprep.subr.mxu0 %v4875_v10 }
 0x348   :  { %4173 = vmatprep.subr.mxu1 %v4875_v10  ;;  %4183 = vmatpush3.msra.mxu0 %v5055_v11 }
 0x349   :  { %4174 = vmatpush3.msra.mxu1 %v5167_v52  ;;  %4184 = vmatprep.subr.mxu0 %v4875_v10 }
 0x34a   :  { %4175 = vmatprep.subr.mxu1 %v4875_v10  ;;  %4185 = vmatpush3.msra.mxu0 %v5069_v13 }
 0x34b   :  { %4176 = vmatpush3.msra.mxu1 %v5176_v53  ;;  %4186 = vmatprep.subr.mxu0 %v4875_v10 }
 0x34c   :  { %4178 = vmatmul.mubr.msk.f32.vlgmr.msra.gmra.mxu1 %vm449_vm2, %v942_v22  ;;  %4191 = vmatprep.subr.mxu1 %v4875_v10 }
 0x34d   :  { %4192 = vmatpush3.msra.mxu1 %v5048_v9  ;;  %4187 = vmatpush3.msra.mxu0 %v5083_v15 }
 0x34e   :  { %4193 = vmatprep.subr.mxu1 %v4875_v10  ;;  %4188 = vmatprep.mubr.msk.f32.mxu0 %vm4876_vm1, %v4875_v10 }
 0x34f   :  { %4194 = vmatpush3.msra.mxu1 %v5060_v12  ;;  %4199 = vmatprep.mubr.msk.f32.mxu1 %vm4876_vm1, %v4875_v10 }
 0x350   :  { %4195 = vmatprep.subr.mxu1 %v4875_v10  ;;  %4202 = vmatprep.subr.mxu0 %v4875_v10 }
 0x351   :  { %4196 = vmatpush3.msra.mxu1 %v5074_v14 }
 0x352   :  { %4197 = vmatprep.subr.mxu1 %v4875_v10 }
 0x353   :  { %4198 = vmatpush3.msra.mxu1 %v5090_v16 }
 0x354   :  { %4213 = vmatprep.subr.mxu1 %v4875_v10 }
 0x404   :  { %v1011_v23 = vpop.f32.mrf.mxu1  ;;  %v1081_v26 = vpop.f32.mrf.mxu0 }
 0x405   :  { %v1012_v27 = vadd.f32 %v5113_v21, %v1011_v23  ;;  %v1082_v34 = vadd.f32 %v5131_v33, %v1081_v26 }
 0x406   :  { %v4157_v28 = vpop.f32.mrf.mxu1  ;;  %v4168_v29 = vpop.f32.mrf.mxu0 }
 0x407   :  { %v1156_v31 = vrot.slane %v1012_v27, 2  ;;  %v1166_v37 = vrot.slane %v1082_v34, 2 }
 0x409   :  { %v1158_v35 = vadd.f32 %v1156_v31, %v5115_v24  ;;  %v1168_v41 = vadd.f32 %v1166_v37, %v5126_v32 }
 0x40b   :  { %v3737_v36 = vmul.f32 -1.442695, %v1158_v35  ;;  %v3738_v42 = vmul.f32 -1.442695, %v1168_v41 }
 0x40c   :  { %v1151_v38 = vpop.f32.mrf.mxu1 }
 0x40d   :  { %4638 = vpow2.f32 %v3737_v36  ;;  %v1152_v47 = vadd.f32 %v5138_v40, %v1151_v38 }
 0x40e   :  { %v4179_v39 = vpop.f32.mrf.mxu1  ;;  %4640 = vpow2.f32 %v3738_v42 }
 0x40f   :  { %v1176_v49 = vrot.slane %v1152_v47, 2 }
 0x41a   :  { %v4639_v44 = vpop.eup %4638 }
 0x41b   :  { %v1162_v45 = vadd.f32 1.0, %v4639_v44  ;;  %v4641_v46 = vpop.eup %4640 }
 0x41c   :  { %v1172_v48 = vadd.f32 1.0, %v4641_v46 }
 0x41d   :  { %4642 = vrcp.f32 %v1162_v45 }
 0x41e   :  { %4644 = vrcp.f32 %v1172_v48 }
 0x42a   :  { %v4643_v54 = vpop.eup %4642 }
 0x42b   :  { %v1178_v24 = vmul.f32 %v4643_v54, %v1176_v49  ;;  %v4645_v56 = vpop.eup %4644 }
 0x42c   :  { %v1181_v32 = vsub.f32 1.0, %v4645_v56  ;;  %v1185_v60 = vmul.f32 %v4645_v56, %v1183_v57 }
 0x42d   :  { %v1179_v55 = vadd.f32 %v1178_v24, %v5140_v43 }
 0x42f   :  { %4646 = vtanh.f32 %v1179_v55 }
 0x43c   :  { %v4647_v58 = vpop.eup %4646 }
 0x43d   :  { %v1182_v59 = vmul.f32 %v4647_v58, %v1181_v32 }
 0x43f   :  { %v1186_v61 = vadd.f32 %v1185_v60, %v1182_v59 }
 0x441   :  { %v1188_v62 = vrot.slane %v1186_v61, 6 }
 0x443   :  { %4189 = vmatmul.mubr.msk.f32.vlgmr.msra.gmra.mxu0 %vm449_vm2, %v1188_v62  ;;  %4200 = vmatmul.mubr.msk.f32.vlgmr.msra.gmra.mxu1 %vm449_vm2, %v1188_v62 }
 0x444   :  { %4203 = vmatpush3.msra.mxu0 %v5149_v50  ;;  %4210 = vmatprep.mubr.msk.f32.mxu0 %vm4876_vm1, %v4875_v10 }
 0x445   :  { %4204 = vmatprep.subr.mxu0 %v4875_v10  ;;  %4214 = vmatpush3.msra.mxu1 %v5043_v8 }
 0x446   :  { %4205 = vmatpush3.msra.mxu0 %v5158_v51  ;;  %4215 = vmatprep.subr.mxu1 %v4875_v10 }
 0x447   :  { %4206 = vmatprep.subr.mxu0 %v4875_v10  ;;  %4216 = vmatpush3.msra.mxu1 %v5055_v11 }
 0x448   :  { %4207 = vmatpush3.msra.mxu0 %v5167_v52  ;;  %4217 = vmatprep.subr.mxu1 %v4875_v10 }
 0x449   :  { %4208 = vmatprep.subr.mxu0 %v4875_v10  ;;  %4218 = vmatpush3.msra.mxu1 %v5069_v13 }
 0x44a   :  { %4209 = vmatpush3.msra.mxu0 %v5176_v53  ;;  %4219 = vmatprep.subr.mxu1 %v4875_v10 }
 0x44b   :  { %4211 = vmatmul.mubr.msk.f32.vlgmr.msra.gmra.mxu0 %vm449_vm2, %v1188_v62  ;;  %4224 = vmatprep.subr.mxu0 %v4875_v10 }
 0x44c   :  { %4225 = vmatpush3.msra.mxu0 %v5048_v9  ;;  %4220 = vmatpush3.msra.mxu1 %v5083_v15 }
 0x44d   :  { %4226 = vmatprep.subr.mxu0 %v4875_v10  ;;  %4221 = vmatprep.mubr.msk.f32.mxu1 %vm4876_vm1, %v4875_v10 }
 0x44e   :  { %4227 = vmatpush3.msra.mxu0 %v5060_v12  ;;  %4232 = vmatprep.mubr.msk.f32.mxu0 %vm4876_vm1, %v4875_v10 }
 0x44f   :  { %4228 = vmatprep.subr.mxu0 %v4875_v10  ;;  %4235 = vmatprep.subr.mxu1 %v4875_v10 }
 0x450   :  { %4229 = vmatpush3.msra.mxu0 %v5074_v14 }
 0x451   :  { %4230 = vmatprep.subr.mxu0 %v4875_v10 }
 0x452   :  { %4231 = vmatpush3.msra.mxu0 %v5090_v16 }
 0x453   :  { %4246 = vmatprep.subr.mxu0 %v4875_v10 }
 0x503   :  { %v1257_v43 = vpop.f32.mrf.mxu0  ;;  %v1327_v63 = vpop.f32.mrf.mxu1 }
 0x504   :  { %v1258_v0 = vadd.f32 %v5113_v21, %v1257_v43  ;;  %v1328_v6 = vadd.f32 %v5131_v33, %v1327_v63 }
 0x505   :  { %v4190_v1 = vpop.f32.mrf.mxu0  ;;  %v4201_v2 = vpop.f32.mrf.mxu1 }
 0x506   :  { %v1401_v3 = vadd.f32 %v1258_v0, %v5108_v20  ;;  %v1408_v17 = vadd.f32 %v1328_v6, %v5117_v25 }
 0x508   :  { %v3742_v4 = vmul.f32 -1.442695, %v1401_v3  ;;  %v3743_v19 = vmul.f32 -1.442695, %v1408_v17 }
 0x50a   :  { %4648 = vpow2.f32 %v3742_v4 }
 0x50b   :  { %v1397_v7 = vpop.f32.mrf.mxu0  ;;  %4650 = vpow2.f32 %v3743_v19 }
 0x50c   :  { %v1398_v28 = vadd.f32 %v5138_v40, %v1397_v7 }
 0x50d   :  { %v4212_v18 = vpop.f32.mrf.mxu0 }
 0x517   :  { %v4649_v22 = vpop.eup %4648 }
 0x518   :  { %v1405_v23 = vadd.f32 1.0, %v4649_v22  ;;  %v4651_v26 = vpop.eup %4650 }
 0x519   :  { %v1412_v27 = vadd.f32 1.0, %v4651_v26 }
 0x51a   :  { %4652 = vrcp.f32 %v1405_v23 }
 0x51b   :  { %4654 = vrcp.f32 %v1412_v27 }
 0x527   :  { %v4653_v29 = vpop.eup %4652 }
 0x528   :  { %v1415_v31 = vmul.f32 %v4653_v29, %v1398_v28  ;;  %v4655_v35 = vpop.eup %4654 }
 0x529   :  { %v1418_v36 = vsub.f32 1.0, %v4655_v35  ;;  %v1421_v39 = vmul.f32 %v4655_v35, %v1188_v62 }
 0x52a   :  { %v1416_v34 = vadd.f32 %v1415_v31, %v5124_v30 }
 0x52c   :  { %4656 = vtanh.f32 %v1416_v34 }
 0x539   :  { %v4657_v37 = vpop.eup %4656 }
 0x53a   :  { %v1419_v38 = vmul.f32 %v4657_v37, %v1418_v36 }
 0x53c   :  { %v5334_v41 = vadd.f32 %v1421_v39, %v1419_v38 }
 0x53e   :  { %4222 = vmatmul.mubr.msk.f32.vlgmr.msra.gmra.mxu1 %vm449_vm2, %v5334_v41  ;;  %4233 = vmatmul.mubr.msk.f32.vlgmr.msra.gmra.mxu0 %vm449_vm2, %v5334_v41  ;;  %v1664_v6 = vrot.slane %v5334_v41, 6 }
 0x53f   :  { %4236 = vmatpush3.msra.mxu1 %v5149_v50  ;;  %4243 = vmatprep.mubr.msk.f32.mxu1 %vm4876_vm1, %v4875_v10 }
 0x540   :  { %4237 = vmatprep.subr.mxu1 %v4875_v10  ;;  %4247 = vmatpush3.msra.mxu0 %v5043_v8 }
 0x541   :  { %4238 = vmatpush3.msra.mxu1 %v5158_v51  ;;  %4248 = vmatprep.subr.mxu0 %v4875_v10 }
 0x542   :  { %4239 = vmatprep.subr.mxu1 %v4875_v10  ;;  %4249 = vmatpush3.msra.mxu0 %v5055_v11 }
 0x543   :  { %4240 = vmatpush3.msra.mxu1 %v5167_v52  ;;  %4250 = vmatprep.subr.mxu0 %v4875_v10 }
 0x544   :  { %4241 = vmatprep.subr.mxu1 %v4875_v10  ;;  %4251 = vmatpush3.msra.mxu0 %v5069_v13 }
 0x545   :  { %4242 = vmatpush3.msra.mxu1 %v5176_v53  ;;  %4252 = vmatprep.subr.mxu0 %v4875_v10 }
 0x546   :  { %4244 = vmatmul.mubr.msk.f32.vlgmr.msra.gmra.mxu1 %vm449_vm2, %v5334_v41  ;;  %4257 = vmatprep.subr.mxu1 %v4875_v10 }
 0x547   :  { %4258 = vmatpush3.msra.mxu1 %v5048_v9  ;;  %4253 = vmatpush3.msra.mxu0 %v5083_v15 }
 0x548   :  { %4259 = vmatprep.subr.mxu1 %v4875_v10  ;;  %4254 = vmatprep.mubr.msk.f32.mxu0 %vm4876_vm1, %v4875_v10 }
 0x549   :  { %4260 = vmatpush3.msra.mxu1 %v5060_v12  ;;  %4265 = vmatprep.mubr.msk.f32.mxu1 %vm4876_vm1, %v4875_v10 }
 0x54a   :  { %4261 = vmatprep.subr.mxu1 %v4875_v10  ;;  %4268 = vmatprep.subr.mxu0 %v4875_v10 }
 0x54b   :  { %4262 = vmatpush3.msra.mxu1 %v5074_v14 }
 0x54c   :  { %4263 = vmatprep.subr.mxu1 %v4875_v10 }
 0x54d   :  { %4264 = vmatpush3.msra.mxu1 %v5090_v16 }
 0x54e   :  { %4279 = vmatprep.subr.mxu1 %v4875_v10 }
 0x5fe   :  { %v1492_v42 = vpop.f32.mrf.mxu1  ;;  %v1562_v44 = vpop.f32.mrf.mxu0 }
 0x5ff   :  { %v1493_v45 = vadd.f32 %v5113_v21, %v1492_v42  ;;  %v1563_v49 = vadd.f32 %v5131_v33, %v1562_v44 }
 0x600   :  { %v4223_v46 = vpop.f32.mrf.mxu1  ;;  %v4234_v47 = vpop.f32.mrf.mxu0 }
 0x601   :  { %v1637_v48 = vrot.slane %v1493_v45, 6  ;;  %v1647_v55 = vrot.slane %v1563_v49, 6 }
 0x603   :  { %v1639_v54 = vadd.f32 %v1637_v48, %v5108_v20  ;;  %v1649_v32 = vadd.f32 %v1647_v55, %v5117_v25  ;;  %v2160_v55 = vld [vmem:[#allocation2] sm:$0xff] }
 0x605   :  { %v3747_v24 = vmul.f32 -1.442695, %v1639_v54  ;;  %v3748_v58 = vmul.f32 -1.442695, %v1649_v32  ;;  %v2520_v32 = vld [vmem:[#allocation5 + $0x30] sm:$0xff] }
 0x606   :  { %v1632_v56 = vpop.f32.mrf.mxu1 }
 0x607   :  { %4658 = vpow2.f32 %v3747_v24  ;;  %v1633_v62 = vadd.f32 %v5138_v40, %v1632_v56  ;;  %v2169_v56 = vrot.slane %v5024_v5, 6  ;;  %v2244_v5 = vld [vmem:[#allocation2 + $0x18] sm:$0xff] }
 0x608   :  { %v4245_v57 = vpop.f32.mrf.mxu1  ;;  %4660 = vpow2.f32 %v3748_v58  ;;  %v2698_v58 = vld [vmem:[#allocation5 + $0xb0] sm:$0xff] }
 0x609   :  { %v1657_v63 = vrot.slane %v1633_v62, 6  ;;  %v2699_v57 = vld [vmem:[#allocation5 + $0xb8] sm:$0xff]  ;;  %v2696_v62 = vld [vmem:[#allocation5 + $0xa0] sm:$0xff] }
 0x614   :  { %v4659_v59 = vpop.eup %4658 }
 0x615   :  { %v1643_v60 = vadd.f32 1.0, %v4659_v59  ;;  %v4661_v61 = vpop.eup %4660  ;;  %v2519_v59 = vld [vmem:[#allocation5 + $0x28] sm:$0xff] }
 0x616   :  { %v1653_v43 = vadd.f32 1.0, %v4661_v61  ;;  %v2518_v61 = vld [vmem:[#allocation5 + $0x20] sm:$0xff] }
 0x617   :  { %4662 = vrcp.f32 %v1643_v60  ;;  %v2697_v60 = vld [vmem:[#allocation5 + $0xa8] sm:$0xff] }
 0x618   :  { %4664 = vrcp.f32 %v1653_v43  ;;  %v2517_v43 = vld [vmem:[#allocation5 + $0x18] sm:$0xff] }
 0x624   :  { %v4663_v0 = vpop.eup %4662 }
 0x625   :  { %v1659_v1 = vmul.f32 %v4663_v0, %v1657_v63  ;;  %v4665_v3 = vpop.eup %4664  ;;  %v2695_v63 = vld [vmem:[#allocation5 + $0x98] sm:$0xff]  ;;  %v2516_v0 = vld [vmem:[#allocation5 + $0x10] sm:$0xff] }
 0x626   :  { %v1662_v4 = vsub.f32 1.0, %v4665_v3  ;;  %v1666_v18 = vmul.f32 %v4665_v3, %v1664_v6  ;;  %v2693_v3 = vld [vmem:[#allocation5 + $0x88] sm:$0xff] }
 0x627   :  { %v1660_v2 = vadd.f32 %v1659_v1, %v5124_v30  ;;  %v2694_v1 = vld [vmem:[#allocation5 + $0x90] sm:$0xff] }
 0x629   :  { %4666 = vtanh.f32 %v1660_v2  ;;  %v2515_v2 = vld [vmem:[#allocation5 + $0x8] sm:$0xff] }
 0x636   :  { %v4667_v7 = vpop.eup %4666 }
 0x637   :  { %v1663_v17 = vmul.f32 %v4667_v7, %v1662_v4  ;;  %v4738_v7 = vld [vmem:[%s5810_s4] ss:$0 sm:$0xff] }
 0x639   :  { %v5379_v19 = vadd.f32 %v1666_v18, %v1663_v17 }
 0x63b   :  { %v1669_v22 = vrot.slane %v5379_v19, 2  ;;  %v1910_v45 = vrot.slane %v5379_v19, 6 }
 0x63d   :  { %4255 = vmatmul.mubr.msk.f32.vlgmr.msra.gmra.mxu0 %vm449_vm2, %v1669_v22  ;;  %4266 = vmatmul.mubr.msk.f32.vlgmr.msra.gmra.mxu1 %vm449_vm2, %v1669_v22 }
 0x63e   :  { %4269 = vmatpush3.msra.mxu0 %v5149_v50  ;;  %4276 = vmatprep.mubr.msk.f32.mxu0 %vm4876_vm1, %v4875_v10 }
 0x63f   :  { %4270 = vmatprep.subr.mxu0 %v4875_v10  ;;  %4280 = vmatpush3.msra.mxu1 %v5043_v8 }
 0x640   :  { %4271 = vmatpush3.msra.mxu0 %v5158_v51  ;;  %4281 = vmatprep.subr.mxu1 %v4875_v10 }
 0x641   :  { %4272 = vmatprep.subr.mxu0 %v4875_v10  ;;  %4282 = vmatpush3.msra.mxu1 %v5055_v11 }
 0x642   :  { %4273 = vmatpush3.msra.mxu0 %v5167_v52  ;;  %4283 = vmatprep.subr.mxu1 %v4875_v10 }
 0x643   :  { %4274 = vmatprep.subr.mxu0 %v4875_v10  ;;  %4284 = vmatpush3.msra.mxu1 %v5069_v13 }
 0x644   :  { %4275 = vmatpush3.msra.mxu0 %v5176_v53  ;;  %4285 = vmatprep.subr.mxu1 %v4875_v10 }
 0x645   :  { %4277 = vmatmul.mubr.msk.f32.vlgmr.msra.gmra.mxu0 %vm449_vm2, %v1669_v22  ;;  %4290 = vmatprep.subr.mxu0 %v4875_v10 }
 0x646   :  { %4291 = vmatpush3.msra.mxu0 %v5048_v9  ;;  %4286 = vmatpush3.msra.mxu1 %v5083_v15 }
 0x647   :  { %4292 = vmatprep.subr.mxu0 %v4875_v10  ;;  %4287 = vmatprep.mubr.msk.f32.mxu1 %vm4876_vm1, %v4875_v10 }
 0x648   :  { %4293 = vmatpush3.msra.mxu0 %v5060_v12  ;;  %4298 = vmatprep.mubr.msk.f32.mxu0 %vm4876_vm1, %v4875_v10 }
 0x649   :  { %4294 = vmatprep.subr.mxu0 %v4875_v10  ;;  %4301 = vmatprep.subr.mxu1 %v4875_v10 }
 0x64a   :  { %4295 = vmatpush3.msra.mxu0 %v5074_v14 }
 0x64b   :  { %4296 = vmatprep.subr.mxu0 %v4875_v10 }
 0x64c   :  { %4297 = vmatpush3.msra.mxu0 %v5090_v16 }
 0x64d   :  { %4312 = vmatprep.subr.mxu0 %v4875_v10 }
 0x6fd   :  { %v1738_v8 = vpop.f32.mrf.mxu0  ;;  %v1808_v9 = vpop.f32.mrf.mxu1 }
 0x6fe   :  { %v1739_v11 = vadd.f32 %v5113_v21, %v1738_v8  ;;  %v1809_v23 = vadd.f32 %v5131_v33, %v1808_v9 }
 0x6ff   :  { %v4256_v12 = vpop.f32.mrf.mxu0  ;;  %v4267_v13 = vpop.f32.mrf.mxu1 }
 0x700   :  { %v1883_v15 = vrot.slane %v1739_v11, 4  ;;  %v1893_v28 = vrot.slane %v1809_v23, 4  ;;  %v3759_v11 = vld [vmem:[%s5812_s6] ss:$0 sm:$0xff] }
 0x701   :  { %v3769_v23 = vld [vmem:[%s5813_s7] ss:$0 sm:$0xff] }
 0x702   :  { %v1885_v26 = vadd.f32 %v1883_v15, %v5108_v20  ;;  %v1895_v16 = vadd.f32 %v1893_v28, %v5117_v25 }
 0x704   :  { %v3752_v27 = vmul.f32 -1.442695, %v1885_v26  ;;  %v3753_v31 = vmul.f32 -1.442695, %v1895_v16  ;;  %v3762_v16 = vld [vmem:[%s5812_s6 + $0x1] ss:$0 sm:$0xff] }
 0x705   :  { %v1878_v14 = vpop.f32.mrf.mxu0 }
 0x706   :  { %4668 = vpow2.f32 %v3752_v27  ;;  %v1879_v36 = vadd.f32 %v5138_v40, %v1878_v14  ;;  %v2161_v40 = vld [vmem:[#allocation2 + $0x8] sm:$0xff] }
 0x707   :  { %v4278_v29 = vpop.f32.mrf.mxu0  ;;  %4670 = vpow2.f32 %v3753_v31 }
 0x708   :  { %v1903_v38 = vrot.slane %v1879_v36, 4 }
 0x713   :  { %v4669_v34 = vpop.eup %4668 }
 0x714   :  { %v1889_v35 = vadd.f32 1.0, %v4669_v34  ;;  %v4671_v21 = vpop.eup %4670  ;;  %v3771_v34 = vld [vmem:[%s5813_s7 + $0x1] ss:$0 sm:$0xff] }
 0x715   :  { %v1899_v37 = vadd.f32 1.0, %v4671_v21 }
 0x716   :  { %4672 = vrcp.f32 %v1889_v35 }
 0x717   :  { %4674 = vrcp.f32 %v1899_v37 }
 0x723   :  { %v4673_v39 = vpop.eup %4672 }
 0x724   :  { %v1905_v41 = vmul.f32 %v4673_v39, %v1903_v38  ;;  %v4675_v44 = vpop.eup %4674 }
 0x725   :  { %v1908_v46 = vsub.f32 1.0, %v4675_v44  ;;  %v1912_v49 = vmul.f32 %v4675_v44, %v1910_v45 }
 0x726   :  { %v1906_v42 = vadd.f32 %v1905_v41, %v5124_v30 }
 0x728   :  { %4676 = vtanh.f32 %v1906_v42 }
 0x735   :  { %v4677_v47 = vpop.eup %4676 }
 0x736   :  { %v1909_v48 = vmul.f32 %v4677_v47, %v1908_v46 }
 0x738   :  { %v5422_v54 = vadd.f32 %v1912_v49, %v1909_v48  ;;  %v4739_v49 = vld [vmem:[%s5810_s4 + $0x2] ss:$0 sm:$0xff]  ;;  %s4877_s4 = smov 32  }
 0x73a   :  { %v1915_v24 = vrot.slane %v5422_v54, 4 }
 0x73c   :  { %4288 = vmatmul.mubr.msk.f32.vlgmr.msra.gmra.mxu1 %vm449_vm2, %v1915_v24  ;;  %4299 = vmatmul.mubr.msk.f32.vlgmr.msra.gmra.mxu0 %vm449_vm2, %v1915_v24 }
 0x73d   :  { %4302 = vmatpush3.msra.mxu1 %v5149_v50  ;;  %4313 = vmatpush3.msra.mxu0 %v2161_v40  ;;  %v2243_v50 = vld [vmem:[#allocation2 + $0x10] sm:$0xff] }
 0x73e   :  { %4303 = vmatprep.subr.mxu1 %v4875_v10  ;;  %4314 = vmatprep.subr.mxu0 %v4875_v10 }
 0x73f   :  { %4304 = vmatpush3.msra.mxu1 %v5158_v51  ;;  %4315 = vmatpush3.msra.mxu0 %v2160_v55  ;;  %v2325_v51 = vld [vmem:[#allocation2 + $0x28] sm:$0xff] }
 0x740   :  { %4305 = vmatprep.subr.mxu1 %v4875_v10  ;;  %4316 = vmatprep.mubr.msk.f32.mxu0 %vm4876_vm1, %v4875_v10 }
 0x741   :  { %4306 = vmatpush3.msra.mxu1 %v5167_v52  ;;  %4317 = vmatmul.mubr.msk.f32.vlgmr.msra.gmra.mxu0 %vm158_vm0, %v2169_v56  ;;  %v2324_v52 = vld [vmem:[#allocation2 + $0x20] sm:$0xff] }
 0x742   :  { %4307 = vmatprep.subr.mxu1 %v4875_v10  ;;  %4309 = vmatprep.mubr.msk.f32.mxu1 %vm4876_vm1, %v4875_v10 }
 0x743   :  { %4308 = vmatpush3.msra.mxu1 %v5176_v53  ;;  %4319 = vmatprep.subr.mxu0 %v4875_v10  ;;  %v2521_v53 = vld [vmem:[#allocation5 + $0x38] sm:$0xff] }
 0x744   :  { %4310 = vmatmul.mubr.msk.f32.vlgmr.msra.gmra.mxu1 %vm449_vm2, %v1915_v24  ;;  %4320 = vmatpush3.msra.mxu0 %v2244_v5 }
 0x745   :  { %4321 = vmatprep.subr.mxu0 %v4875_v10  ;;  %4323 = vmatprep.mubr.msk.f32.mxu0 %vm4876_vm1, %v4875_v10 }
 0x746   :  { %4322 = vmatpush3.msra.mxu0 %v2243_v50  ;;  %4326 = vmatprep.subr.mxu1 %v4875_v10  ;;  %v2156_v50 = vrot.slane %v5422_v54, 6 }
 0x747   :  { %4324 = vmatmul.mubr.msk.f32.vlgmr.msra.gmra.mxu0 %vm158_vm0, %v2169_v56  ;;  %4327 = vmatpush3.msra.mxu1 %v2325_v51 }
 0x748   :  { %4328 = vmatprep.subr.mxu1 %v4875_v10  ;;  %4330 = vmatprep.mubr.msk.f32.mxu1 %vm4876_vm1, %v4875_v10 }
 0x749   :  { %4329 = vmatpush3.msra.mxu1 %v2324_v52  ;;  %4371 = vmatprep.subr.mxu0 %v4875_v10 }
 0x74a   :  { %4331 = vmatmul.mubr.msk.f32.vlgmr.msra.gmra.mxu1 %vm158_vm0, %v2169_v56  ;;  %4333 = vmatprep.subr.mxu1 %v4875_v10  ;;  %v3765_v56 = vld [vmem:[%s5812_s6 + $0x2] ss:$0 sm:$0xff]  ;;  %s4878_s6 = smov 64  }
 0x74b   :  { %4349 = vmatprep.mubr.msk.f32.mxu1 %vm4876_vm1, %v4875_v10  ;;  %4387 = vmatprep.mubr.msk.f32.mxu0 %vm4876_vm1, %v4875_v10 }
 0x74c   :  { %4334 = vmatpush3.msra.mxu1 %v2521_v53  ;;  %4372 = vmatpush3.msra.mxu0 %v2699_v57  ;;  %v3773_v53 = vld [vmem:[%s5813_s7 + $0x2] ss:$0 sm:$0xff] }
 0x74d   :  { %4335 = vmatprep.subr.mxu1 %v4875_v10  ;;  %4373 = vmatprep.subr.mxu0 %v4875_v10 }
 0x74e   :  { %4336 = vmatpush3.msra.mxu1 %v2520_v32  ;;  %4374 = vmatpush3.msra.mxu0 %v2698_v58 }
 0x74f   :  { %4337 = vmatprep.subr.mxu1 %v4875_v10  ;;  %4375 = vmatprep.subr.mxu0 %v4875_v10 }
 0x750   :  { %4338 = vmatpush3.msra.mxu1 %v2519_v59  ;;  %4376 = vmatpush3.msra.mxu0 %v2697_v60 }
 0x751   :  { %4339 = vmatprep.subr.mxu1 %v4875_v10  ;;  %4377 = vmatprep.subr.mxu0 %v4875_v10 }
 0x752   :  { %4340 = vmatpush3.msra.mxu1 %v2518_v61  ;;  %4378 = vmatpush3.msra.mxu0 %v2696_v62  ;;  %v2514_v62 = vld [vmem:[#allocation5] sm:$0xff] }
 0x753   :  { %4341 = vmatprep.subr.mxu1 %v4875_v10  ;;  %4379 = vmatprep.subr.mxu0 %v4875_v10 }
 0x754   :  { %4342 = vmatpush3.msra.mxu1 %v2517_v43  ;;  %4380 = vmatpush3.msra.mxu0 %v2695_v63  ;;  %v2692_v43 = vld [vmem:[#allocation5 + $0x80] sm:$0xff] }
 0x755   :  { %4343 = vmatprep.subr.mxu1 %v4875_v10  ;;  %4381 = vmatprep.subr.mxu0 %v4875_v10 }
 0x756   :  { %4344 = vmatpush3.msra.mxu1 %v2516_v0  ;;  %4382 = vmatpush3.msra.mxu0 %v2694_v1 }
 0x757   :  { %4345 = vmatprep.subr.mxu1 %v4875_v10  ;;  %4383 = vmatprep.subr.mxu0 %v4875_v10 }
 0x758   :  { %4346 = vmatpush3.msra.mxu1 %v2515_v2  ;;  %4384 = vmatpush3.msra.mxu0 %v2693_v3 }
 0x759   :  { %4347 = vmatprep.subr.mxu1 %v4875_v10  ;;  %4385 = vmatprep.subr.mxu0 %v4875_v10 }
 0x75a   :  { %4348 = vmatpush3.msra.mxu1 %v2514_v62  ;;  %4386 = vmatpush3.msra.mxu0 %v2692_v43  ;;  %v5584_v62 = vld [vmem:[%s5817_s11] sm:$0x1] }
 0x75b   :  { %4352 = vmatprep.subr.mxu1 %v4875_v10  ;;  %4409 = vmatprep.subr.mxu0 %v4875_v10 }
 0x7fc   :  { %v1984_v4 = vpop.f32.mrf.mxu1  ;;  %v2054_v6 = vpop.f32.mrf.mxu0 }
 0x7fd   :  { %v1985_v17 = vadd.f32 %v4738_v7, %v1984_v4  ;;  %v2055_v18 = vadd.f32 %v5131_v33, %v2054_v6 }
 0x7fe   :  { %v4289_v19 = vpop.f32.mrf.mxu1  ;;  %v4300_v22 = vpop.f32.mrf.mxu0 }
 0x7ff   :  { %v2129_v8 = vrot.slane %v1985_v17, 2  ;;  %v2139_v9 = vrot.slane %v2055_v18, 2  ;;  %v2612_v19 = vld [vmem:[#allocation5 + $0x78] sm:$0xff] }
 0x800   :  { %v2871_v22 = vld [vmem:[#allocation8 + $0x78] sm:$0xff] }
 0x801   :  { %v2131_v12 = vadd.f32 %v2129_v8, %v5108_v20  ;;  %v2141_v13 = vadd.f32 %v2139_v9, %v5117_v25  ;;  %v2238_v15 = vpop.f32.mrf.mxu0  ;;  %v2611_v8 = vld [vmem:[#allocation5 + $0x70] sm:$0xff] }
 0x802   :  { %v2239_v26 = vadd.f32 %v3759_v11, %v2238_v15  ;;  %v2870_v9 = vld [vmem:[#allocation8 + $0x70] sm:$0xff]  ;;  %v2610_v11 = vld [vmem:[#allocation5 + $0x68] sm:$0xff]  ;;  %v2868_v15 = vld [vmem:[#allocation8 + $0x60] sm:$0xff] }
 0x803   :  { %v3757_v27 = vmul.f32 -1.442695, %v2131_v12  ;;  %v3758_v33 = vmul.f32 -1.442695, %v2141_v13  ;;  %v4318_v28 = vpop.f32.mrf.mxu0  ;;  %v2869_v12 = vld [vmem:[#allocation8 + $0x68] sm:$0xff]  ;;  %v2609_v13 = vld [vmem:[#allocation5 + $0x60] sm:$0xff] }
 0x804   :  { %v2415_v14 = vadd.f32 %v3769_v23, %v2239_v26  ;;  %v2124_v29 = vpop.f32.mrf.mxu1  ;;  %v2608_v23 = vld [vmem:[#allocation5 + $0x58] sm:$0xff]  ;;  %v2606_v28 = vld [vmem:[#allocation5 + $0x48] sm:$0xff] }
 0x805   :  { %4678 = vpow2.f32 %v3757_v27  ;;  %v2125_v24 = vadd.f32 %v4739_v49, %v2124_v29  ;;  %v2867_v26 = vld [vmem:[#allocation8 + $0x58] sm:$0xff]  ;;  %v2607_v27 = vld [vmem:[#allocation5 + $0x50] sm:$0xff]  ;;  %v2605_v29 = vld [vmem:[#allocation5 + $0x40] sm:$0xff] }
 0x806   :  { %4680 = vpow2.f32 %v3758_v33  ;;  %v3770_v20 = vmul.f32 -1.442695, %v2415_v14  ;;  %v4311_v31 = vpop.f32.mrf.mxu1  ;;  %v2866_v33 = vld [vmem:[#allocation8 + $0x50] sm:$0xff]  ;;  %v2865_v14 = vld [vmem:[#allocation8 + $0x48] sm:$0xff]  ;;  %v2468_v49 = vld [vmem:[#allocation7 + $0x78] sm:$0xff] }
 0x807   :  { %v2319_v25 = vpop.f32.mrf.mxu0  ;;  %v2149_v55 = vrot.slane %v2125_v24, 2  ;;  %v2784_v31 = vld [vmem:[#allocation8 + $0x30] sm:$0xff] }
 0x808   :  { %4682 = vpow2.f32 %v3770_v20  ;;  %v2320_v35 = vadd.f32 %v3762_v16, %v2319_v25  ;;  %v2864_v16 = vld [vmem:[#allocation8 + $0x40] sm:$0xff]  ;;  %v2785_v20 = vld [vmem:[#allocation8 + $0x38] sm:$0xff]  ;;  %v2783_v25 = vld [vmem:[#allocation8 + $0x28] sm:$0xff] }
 0x809   :  { %v4325_v21 = vpop.f32.mrf.mxu0  ;;  %v2458_v24 = vld [vmem:[#allocation7 + $0x30] sm:$0xff] }
 0x80a   :  { %v2428_v36 = vadd.f32 %v3771_v34, %v2320_v35  ;;  %v2400_v37 = vpop.f32.mrf.mxu1  ;;  %v2782_v34 = vld [vmem:[#allocation8 + $0x20] sm:$0xff]  ;;  %v2781_v35 = vld [vmem:[#allocation8 + $0x18] sm:$0xff]  ;;  %v2780_v21 = vld [vmem:[#allocation8 + $0x10] sm:$0xff] }
 0x80b   :  { %v2401_v57 = vadd.f32 %v3765_v56, %v2400_v37  ;;  %v2778_v37 = vld [vmem:[#allocation8] sm:$0xff]  ;;  %v2466_v56 = vld [vmem:[#allocation7 + $0x68] sm:$0xff] }
 0x80c   :  { %v3772_v38 = vmul.f32 -1.442695, %v2428_v36  ;;  %v4332_v39 = vpop.f32.mrf.mxu1  ;;  %v2779_v36 = vld [vmem:[#allocation8 + $0x8] sm:$0xff] }
 0x80d   :  { %v2957_v39 = vld [vmem:[#allocation8 + $0xb0] sm:$0xff] }
 0x80e   :  { %4684 = vpow2.f32 %v3772_v38  ;;  %v2958_v38 = vld [vmem:[#allocation8 + $0xb8] sm:$0xff] }
 0x812   :  { %v4679_v41 = vpop.eup %4678 }
 0x813   :  { %v4681_v42 = vpop.eup %4680  ;;  %v2135_v44 = vadd.f32 1.0, %v4679_v41  ;;  %v2956_v41 = vld [vmem:[#allocation8 + $0xa8] sm:$0xff] }
 0x814   :  { %v2145_v45 = vadd.f32 1.0, %v4681_v42  ;;  %v2955_v42 = vld [vmem:[#allocation8 + $0xa0] sm:$0xff] }
 0x815   :  { %v4683_v46 = vpop.eup %4682  ;;  %4686 = vrcp.f32 %v2135_v44  ;;  %v2954_v44 = vld [vmem:[#allocation8 + $0x98] sm:$0xff] }
 0x816   :  { %4688 = vrcp.f32 %v2145_v45  ;;  %v2419_v47 = vadd.f32 1.0, %v4683_v46  ;;  %v2953_v45 = vld [vmem:[#allocation8 + $0x90] sm:$0xff]  ;;  %v2952_v46 = vld [vmem:[#allocation8 + $0x88] sm:$0xff] }
 0x818   :  { %4690 = vrcp.f32 %v2419_v47  ;;  %v2951_v47 = vld [vmem:[#allocation8 + $0x80] sm:$0xff] }
 0x81b   :  { %v4685_v48 = vpop.eup %4684 }
 0x81c   :  { %v2432_v40 = vadd.f32 1.0, %v4685_v48  ;;  %v2459_v48 = vld [vmem:[#allocation7 + $0x38] sm:$0xff] }
 0x81e   :  { %4692 = vrcp.f32 %v2432_v40  ;;  %v2467_v40 = vld [vmem:[#allocation7 + $0x70] sm:$0xff] }
 0x822   :  { %v4687_v5 = vpop.eup %4686 }
 0x823   :  { %v4689_v51 = vpop.eup %4688  ;;  %v2151_v52 = vmul.f32 %v4687_v5, %v2149_v55  ;;  %v2457_v55 = vld [vmem:[#allocation7 + $0x28] sm:$0xff]  ;;  %v2456_v5 = vld [vmem:[#allocation7 + $0x20] sm:$0xff] }
 0x824   :  { %v2158_v32 = vmul.f32 %v4689_v51, %v2156_v50  ;;  %v2154_v63 = vsub.f32 1.0, %v4689_v51  ;;  %v2465_v50 = vld [vmem:[#allocation7 + $0x60] sm:$0xff]  ;;  %v2455_v51 = vld [vmem:[#allocation7 + $0x18] sm:$0xff] }
 0x825   :  { %v4691_v58 = vpop.eup %4690  ;;  %v2152_v59 = vadd.f32 %v2151_v52, %v5124_v30  ;;  %v2464_v52 = vld [vmem:[#allocation7 + $0x58] sm:$0xff] }
 0x826   :  { %v2441_v60 = vmul.f32 %v4691_v58, %v3773_v53  ;;  %v2454_v53 = vld [vmem:[#allocation7 + $0x10] sm:$0xff]  ;;  %v2462_v58 = vld [vmem:[#allocation7 + $0x48] sm:$0xff] }
 0x827   :  { %4694 = vtanh.f32 %v2152_v59  ;;  %v2452_v59 = vld [vmem:[#allocation7] sm:$0xff] }
 0x828   :  { %v2442_v61 = vadd.f32 %v2441_v60, %v2401_v57  ;;  %v2463_v57 = vld [vmem:[#allocation7 + $0x50] sm:$0xff]  ;;  %v2461_v60 = vld [vmem:[#allocation7 + $0x40] sm:$0xff] }
 0x82a   :  { %4696 = vtanh.f32 %v2442_v61  ;;  %v3778_v61 = vld [vmem:[%s5816_s10] ss:$0 sm:$0xff] }
 0x82b   :  { %v4693_v54 = vpop.eup %4692 }
 0x82c   :  { %v2444_v1 = vsub.f32 1.0, %v4693_v54 }
 0x834   :  { %v4695_v0 = vpop.eup %4694 }
 0x835   :  { %v2155_v2 = vmul.f32 %v4695_v0, %v2154_v63 }
 0x837   :  { %v4697_v3 = vpop.eup %4696  ;;  %v2159_v4 = vadd.f32 %v2158_v32, %v2155_v2  ;;  %v2453_v32 = vld [vmem:[#allocation7 + $0x8] sm:$0xff] }
 0x838   :  { %v2445_v30 = vmul.f32 %v4697_v3, %v2444_v1 }
 0x83a   :  { %v2447_v6 = vrot.slane %v2445_v30, 2  ;;  %v5596_v30 = vld [vmem:[%s5817_s11 + $0x1] sm:$0x1] }
 0x83c   :  { %2448 = vrot.lane.b32.xlu0 %v2447_v6, %s4877_s4 }
 0x8ae   :  { %v2449_v7 = vpop.permute.xlu0 %2448 }
 0x8af   :  { %v2451_v17 = vsel %vm449_vm2, %v2159_v4, %v2449_v7  ;;  %v3781_v4 = vld [vmem:[%s5816_s10 + $0x1] ss:$0 sm:$0xff] }
 0x8b0   :  { %v5504_v18 = vrot.slane %v2451_v17, 6 }
 0x8b2   :  { %4350 = vmatmul.mubr.msk.f32.vlgmr.msra.gmra.mxu1 %vm2531_vm3, %v5504_v18  ;;  %4388 = vmatmul.mubr.msk.f32.vlgmr.msra.gmra.mxu0 %vm2531_vm3, %v5504_v18 }
 0x8b3   :  { %4353 = vmatpush3.msra.mxu1 %v2612_v19  ;;  %4410 = vmatpush3.msra.mxu0 %v2871_v22 }
 0x8b4   :  { %4354 = vmatprep.subr.mxu1 %v4875_v10  ;;  %4411 = vmatprep.subr.mxu0 %v4875_v10 }
 0x8b5   :  { %4355 = vmatpush3.msra.mxu1 %v2611_v8  ;;  %4412 = vmatpush3.msra.mxu0 %v2870_v9 }
 0x8b6   :  { %4356 = vmatprep.subr.mxu1 %v4875_v10  ;;  %4413 = vmatprep.subr.mxu0 %v4875_v10 }
 0x8b7   :  { %4357 = vmatpush3.msra.mxu1 %v2610_v11  ;;  %4414 = vmatpush3.msra.mxu0 %v2869_v12  ;;  %v3302_v12 = vlaneseq }
 0x8b8   :  { %4358 = vmatprep.subr.mxu1 %v4875_v10  ;;  %4415 = vmatprep.subr.mxu0 %v4875_v10 }
 0x8b9   :  { %4359 = vmatpush3.msra.mxu1 %v2609_v13  ;;  %4416 = vmatpush3.msra.mxu0 %v2868_v15  ;;  %v3303_v13 = vshrl.u32 %v3302_v12, 7  ;;  %v5605_v15 = vld [vmem:[%s5821_s15] sm:$0x1] }
 0x8ba   :  { %4360 = vmatprep.subr.mxu1 %v4875_v10  ;;  %4417 = vmatprep.subr.mxu0 %v4875_v10 }
 0x8bb   :  { %4361 = vmatpush3.msra.mxu1 %v2608_v23  ;;  %4418 = vmatpush3.msra.mxu0 %v2867_v26  ;;  %v5607_v23 = vsub.s32 0, %v3303_v13  ;;  %v3786_v26 = vld [vmem:[%s5820_s14] ss:$0 sm:$0xff]  ;;  %v2497_v13 = vld [vmem:[#allocation10 + $0x68] sm:$0xff] }
 0x8bc   :  { %4362 = vmatprep.subr.mxu1 %v4875_v10  ;;  %4419 = vmatprep.subr.mxu0 %v4875_v10 }
 0x8bd   :  { %4363 = vmatpush3.msra.mxu1 %v2607_v27  ;;  %4420 = vmatpush3.msra.mxu0 %v2866_v33  ;;  %v3305_v27 = vrot.slane %v5605_v15, %v5607_v23 }
 0x8be   :  { %4364 = vmatprep.subr.mxu1 %v4875_v10  ;;  %4421 = vmatprep.subr.mxu0 %v4875_v10 }
 0x8bf   :  { %4365 = vmatpush3.msra.mxu1 %v2606_v28  ;;  %4422 = vmatpush3.msra.mxu0 %v2865_v14  ;;  %v5617_v28 = vld [vmem:[%s5817_s11 + $0x2] sm:$0x1] }
 0x8c0   :  { %4366 = vmatprep.subr.mxu1 %v4875_v10  ;;  %4423 = vmatprep.subr.mxu0 %v4875_v10  ;;  %v3784_v14 = vld [vmem:[%s5816_s10 + $0x2] ss:$0 sm:$0xff] }
 0x8c1   :  { %4367 = vmatpush3.msra.mxu1 %v2605_v29  ;;  %4368 = vmatprep.mubr.msk.f32.mxu1 %vm4876_vm1, %v4875_v10 }
 0x8c2   :  { %4424 = vmatpush3.msra.mxu0 %v2864_v16  ;;  %4425 = vmatprep.mubr.msk.f32.mxu0 %vm4876_vm1, %v4875_v10 }
 0x8c3   :  { %4369 = vmatmul.mubr.msk.f32.vlgmr.msra.gmra.mxu1 %vm2531_vm3, %v5504_v18  ;;  %4390 = vmatprep.subr.mxu1 %v4875_v10 }
 0x8c4   :  { %4426 = vmatmul.mubr.msk.f32.vlgmr.msra.gmra.mxu0 %vm2531_vm3, %v5504_v18  ;;  %4391 = vmatpush3.msra.mxu1 %v2785_v20 }
 0x8c5   :  { %4392 = vmatprep.subr.mxu1 %v4875_v10  ;;  %4406 = vmatprep.mubr.msk.f32.mxu1 %vm4876_vm1, %v4875_v10 }
 0x8c6   :  { %4393 = vmatpush3.msra.mxu1 %v2784_v31  ;;  %4447 = vmatprep.subr.mxu0 %v4875_v10 }
 0x8c7   :  { %4394 = vmatprep.subr.mxu1 %v4875_v10  ;;  %4463 = vmatprep.mubr.msk.f32.mxu0 %vm4876_vm1, %v4875_v10 }
 0x8c8   :  { %4395 = vmatpush3.msra.mxu1 %v2783_v25  ;;  %4448 = vmatpush3.msra.mxu0 %v2459_v48 }
 0x8c9   :  { %4396 = vmatprep.subr.mxu1 %v4875_v10  ;;  %4449 = vmatprep.subr.mxu0 %v4875_v10 }
 0x8ca   :  { %4397 = vmatpush3.msra.mxu1 %v2782_v34  ;;  %4450 = vmatpush3.msra.mxu0 %v2458_v24 }
 0x8cb   :  { %4398 = vmatprep.subr.mxu1 %v4875_v10  ;;  %4451 = vmatprep.subr.mxu0 %v4875_v10 }
 0x8cc   :  { %4399 = vmatpush3.msra.mxu1 %v2781_v35  ;;  %4452 = vmatpush3.msra.mxu0 %v2457_v55 }
 0x8cd   :  { %4400 = vmatprep.subr.mxu1 %v4875_v10  ;;  %4453 = vmatprep.subr.mxu0 %v4875_v10 }
 0x8ce   :  { %4401 = vmatpush3.msra.mxu1 %v2780_v21  ;;  %4454 = vmatpush3.msra.mxu0 %v2456_v5 }
 0x8cf   :  { %4402 = vmatprep.subr.mxu1 %v4875_v10  ;;  %4455 = vmatprep.subr.mxu0 %v4875_v10 }
 0x8d0   :  { %4403 = vmatpush3.msra.mxu1 %v2779_v36  ;;  %4456 = vmatpush3.msra.mxu0 %v2455_v51  ;;  %v5631_v36 = vld [vmem:[%s5821_s15 + $0x1] sm:$0x1] }
 0x8d1   :  { %4404 = vmatprep.subr.mxu1 %v4875_v10  ;;  %4457 = vmatprep.subr.mxu0 %v4875_v10  ;;  %v2476_v51 = vld [vmem:[#allocation7 + $0xb0] sm:$0xff] }
 0x8d2   :  { %4405 = vmatpush3.msra.mxu1 %v2778_v37  ;;  %4458 = vmatpush3.msra.mxu0 %v2454_v53  ;;  %v3789_v37 = vld [vmem:[%s5820_s14 + $0x1] ss:$0 sm:$0xff]  ;;  %v2475_v53 = vld [vmem:[#allocation7 + $0xa8] sm:$0xff] }
 0x8d3   :  { %4407 = vmatmul.mubr.msk.f32.vlgmr.msra.gmra.mxu1 %vm2531_vm3, %v5504_v18  ;;  %4428 = vmatprep.subr.mxu1 %v4875_v10 }
 0x8d4   :  { %4429 = vmatpush3.msra.mxu1 %v2958_v38  ;;  %4444 = vmatprep.mubr.msk.f32.mxu1 %vm4876_vm1, %v4875_v10 }
 0x8d5   :  { %4430 = vmatprep.subr.mxu1 %v4875_v10  ;;  %4459 = vmatprep.subr.mxu0 %v4875_v10 }
 0x8d6   :  { %4431 = vmatpush3.msra.mxu1 %v2957_v39  ;;  %4460 = vmatpush3.msra.mxu0 %v2453_v32  ;;  %v2474_v32 = vld [vmem:[#allocation7 + $0xa0] sm:$0xff] }
 0x8d7   :  { %4432 = vmatprep.subr.mxu1 %v4875_v10  ;;  %4461 = vmatprep.subr.mxu0 %v4875_v10 }
 0x8d8   :  { %4433 = vmatpush3.msra.mxu1 %v2956_v41  ;;  %4462 = vmatpush3.msra.mxu0 %v2452_v59  ;;  %v2473_v59 = vld [vmem:[#allocation7 + $0x98] sm:$0xff] }
 0x8d9   :  { %4434 = vmatprep.subr.mxu1 %v4875_v10  ;;  %4485 = vmatprep.subr.mxu0 %v4875_v10 }
 0x8da   :  { %4435 = vmatpush3.msra.mxu1 %v2955_v42  ;;  %v3318_v42 = vrot.slane %v5631_v36, %v5607_v23 }
 0x8db   :  { %4436 = vmatprep.subr.mxu1 %v4875_v10 }
 0x8dc   :  { %4437 = vmatpush3.msra.mxu1 %v2954_v44 }
 0x8dd   :  { %4438 = vmatprep.subr.mxu1 %v4875_v10 }
 0x8de   :  { %4439 = vmatpush3.msra.mxu1 %v2953_v45 }
 0x8df   :  { %4440 = vmatprep.subr.mxu1 %v4875_v10 }
 0x8e0   :  { %4441 = vmatpush3.msra.mxu1 %v2952_v46 }
 0x8e1   :  { %4442 = vmatprep.subr.mxu1 %v4875_v10 }
 0x8e2   :  { %4443 = vmatpush3.msra.mxu1 %v2951_v47 }
 0x8e3   :  { %4445 = vmatmul.mubr.msk.f32.vlgmr.msra.gmra.mxu1 %vm2531_vm3, %v5504_v18  ;;  %4466 = vmatprep.subr.mxu1 %v4875_v10 }
 0x8e4   :  { %4482 = vmatprep.mubr.msk.f32.mxu1 %vm4876_vm1, %v4875_v10  ;;  %4467 = vmatpush3.msra.mxu1 %v2468_v49 }
 0x8e5   :  { %4468 = vmatprep.subr.mxu1 %v4875_v10 }
 0x8e6   :  { %4469 = vmatpush3.msra.mxu1 %v2467_v40 }
 0x8e7   :  { %4470 = vmatprep.subr.mxu1 %v4875_v10 }
 0x8e8   :  { %4471 = vmatpush3.msra.mxu1 %v2466_v56  ;;  %v2477_v56 = vld [vmem:[#allocation7 + $0xb8] sm:$0xff] }
 0x8e9   :  { %4472 = vmatprep.subr.mxu1 %v4875_v10 }
 0x8ea   :  { %4473 = vmatpush3.msra.mxu1 %v2465_v50  ;;  %v2490_v50 = vld [vmem:[#allocation10 + $0x38] sm:$0xff] }
 0x8eb   :  { %4474 = vmatprep.subr.mxu1 %v4875_v10 }
 0x8ec   :  { %4475 = vmatpush3.msra.mxu1 %v2464_v52  ;;  %v2489_v52 = vld [vmem:[#allocation10 + $0x30] sm:$0xff] }
 0x8ed   :  { %4476 = vmatprep.subr.mxu1 %v4875_v10 }
 0x8ee   :  { %4477 = vmatpush3.msra.mxu1 %v2463_v57  ;;  %v2488_v57 = vld [vmem:[#allocation10 + $0x28] sm:$0xff] }
 0x8ef   :  { %4478 = vmatprep.subr.mxu1 %v4875_v10 }
 0x8f0   :  { %4479 = vmatpush3.msra.mxu1 %v2462_v58  ;;  %v2487_v58 = vld [vmem:[#allocation10 + $0x20] sm:$0xff] }
 0x8f1   :  { %4480 = vmatprep.subr.mxu1 %v4875_v10 }
 0x8f2   :  { %4481 = vmatpush3.msra.mxu1 %v2461_v60  ;;  %v2486_v60 = vld [vmem:[#allocation10 + $0x18] sm:$0xff] }
 0x8f3   :  { %4504 = vmatprep.subr.mxu1 %v4875_v10 }
 0x972   :  { %v2600_v43 = vpop.f32.mrf.mxu1  ;;  %v2774_v54 = vpop.f32.mrf.mxu0 }
 0x973   :  { %v5586_v63 = vadd.f32 %v3778_v61, %v2600_v43  ;;  %v5625_v34 = vadd.f32 %v3784_v14, %v2774_v54  ;;  %v5661_v43 = vld [vmem:[%s5821_s15 + $0x2] sm:$0x1] }
 0x974   :  { %v4351_v0 = vpop.f32.mrf.mxu1  ;;  %v4389_v1 = vpop.f32.mrf.mxu0  ;;  %v2472_v54 = vld [vmem:[#allocation7 + $0x90] sm:$0xff] }
 0x975   :  { %v3037_v2 = vadd.f32 %v5586_v63, %v5584_v62  ;;  %v2485_v0 = vld [vmem:[#allocation10 + $0x10] sm:$0xff]  ;;  %v2471_v1 = vld [vmem:[#allocation7 + $0x88] sm:$0xff] }
 0x977   :  { %v3794_v3 = vmul.f32 -1.442695, %v3037_v2 }
 0x979   :  { %4698 = vpow2.f32 %v3794_v3  ;;  %v3331_v3 = vrot.slane %v5661_v43, %v5607_v23  ;;  %v2496_v23 = vld [vmem:[#allocation10 + $0x60] sm:$0xff] }
 0x983   :  { %v2687_v6 = vpop.f32.mrf.mxu1 }
 0x984   :  { %v5598_v7 = vadd.f32 %v3781_v4, %v2687_v6  ;;  %v2946_v17 = vpop.f32.mrf.mxu0  ;;  %v2484_v4 = vld [vmem:[#allocation10 + $0x8] sm:$0xff]  ;;  %v3792_v6 = vld [vmem:[%s5820_s14 + $0x2] ss:$0 sm:$0xff] }
 0x985   :  { %v4370_v18 = vpop.f32.mrf.mxu1  ;;  %v5637_v41 = vadd.f32 %v3789_v37, %v2946_v17  ;;  %v2470_v17 = vld [vmem:[#allocation7 + $0x80] sm:$0xff]  ;;  %v2507_v37 = vld [vmem:[#allocation10 + $0xb0] sm:$0xff] }
 0x986   :  { %v4699_v19 = vpop.eup %4698  ;;  %v3044_v22 = vadd.f32 %v5596_v30, %v5598_v7  ;;  %v4427_v8 = vpop.f32.mrf.mxu0 }
 0x987   :  { %v3041_v9 = vadd.f32 1.0, %v4699_v19  ;;  %v3320_v44 = vadd.f32 %v3318_v42, %v5637_v41  ;;  %v2499_v19 = vld [vmem:[#allocation10 + $0x78] sm:$0xff] }
 0x988   :  { %v3795_v11 = vmul.f32 -1.442695, %v3044_v22  ;;  %v2483_v22 = vld [vmem:[#allocation10] sm:$0xff]  ;;  %v2504_v42 = vld [vmem:[#allocation10 + $0x98] sm:$0xff] }
 0x989   :  { %4700 = vrcp.f32 %v3041_v9  ;;  %v3802_v45 = vmul.f32 -1.442695, %v3320_v44  ;;  %v2503_v44 = vld [vmem:[#allocation10 + $0x90] sm:$0xff] }
 0x98a   :  { %4702 = vpow2.f32 %v3795_v11  ;;  %v2498_v11 = vld [vmem:[#allocation10 + $0x70] sm:$0xff] }
 0x993   :  { %v2859_v33 = vpop.f32.mrf.mxu1 }
 0x994   :  { %v5622_v29 = vadd.f32 %v3786_v26, %v2859_v33  ;;  %v2495_v26 = vld [vmem:[#allocation10 + $0x58] sm:$0xff]  ;;  %v2493_v33 = vld [vmem:[#allocation10 + $0x48] sm:$0xff] }
 0x995   :  { %v4408_v16 = vpop.f32.mrf.mxu1 }
 0x996   :  { %v4701_v20 = vpop.eup %4700  ;;  %v3307_v31 = vadd.f32 %v3305_v27, %v5622_v29  ;;  %v2494_v27 = vld [vmem:[#allocation10 + $0x50] sm:$0xff]  ;;  %v2492_v16 = vld [vmem:[#allocation10 + $0x40] sm:$0xff] }
 0x997   :  { %v4703_v25 = vpop.eup %4702  ;;  %v3051_v35 = vmul.f32 %v4701_v20, %v5617_v28 }
 0x998   :  { %v3048_v21 = vadd.f32 1.0, %v4703_v25  ;;  %v3801_v39 = vmul.f32 -1.442695, %v3307_v31 }
 0x999   :  { %v3052_v38 = vadd.f32 %v3051_v35, %v5625_v34 }
 0x99a   :  { %4704 = vrcp.f32 %v3048_v21  ;;  %v2508_v21 = vld [vmem:[#allocation10 + $0xb8] sm:$0xff] }
 0x99b   :  { %4706 = vtanh.f32 %v3052_v38  ;;  %v2506_v38 = vld [vmem:[#allocation10 + $0xa8] sm:$0xff] }
 0x99c   :  { %4708 = vpow2.f32 %v3801_v39  ;;  %v2505_v39 = vld [vmem:[#allocation10 + $0xa0] sm:$0xff] }
 0x99d   :  { %4710 = vpow2.f32 %v3802_v45  ;;  %v2502_v45 = vld [vmem:[#allocation10 + $0x88] sm:$0xff] }
 0x9a3   :  { %v5642_v46 = vpop.f32.mrf.mxu1 }
 0x9a4   :  { %v5676_v8 = vadd.f32 %v3792_v6, %v5642_v46  ;;  %v2501_v46 = vld [vmem:[#allocation10 + $0x80] sm:$0xff] }
 0x9a5   :  { %v4446_v47 = vpop.f32.mrf.mxu1 }
 0x9a6   :  { %v3597_v47 = vld [vmem:[%s5822_s16 + $0x78] sm:$0xff] }
 0x9a7   :  { %v4705_v48 = vpop.eup %4704 }
 0x9a8   :  { %v4707_v49 = vpop.eup %4706  ;;  %v3054_v24 = vsub.f32 1.0, %v4705_v48  ;;  %v3596_v48 = vld [vmem:[%s5822_s16 + $0x70] sm:$0xff] }
 0x9a9   :  { %v4709_v40 = vpop.eup %4708 }
 0x9aa   :  { %v5644_v55 = vmul.f32 %v4707_v49, %v3054_v24  ;;  %v3311_v5 = vadd.f32 1.0, %v4709_v40  ;;  %v4711_v61 = vpop.eup %4710  ;;  %v3595_v49 = vld [vmem:[%s5822_s16 + $0x68] sm:$0xff]  ;;  %v3594_v24 = vld [vmem:[%s5822_s16 + $0x60] sm:$0xff]  ;;  %v3593_v40 = vld [vmem:[%s5822_s16 + $0x58] sm:$0xff] }
 0x9ab   :  { %v3324_v2 = vadd.f32 1.0, %v4711_v61 }
 0x9ac   :  { %4464 = vmatmul.mubr.msk.f32.vlgmr.msra.gmra.mxu0 %vm2531_vm3, %v5644_v55  ;;  %4483 = vmatmul.mubr.msk.f32.vlgmr.msra.gmra.mxu1 %vm2531_vm3, %v5644_v55  ;;  %4712 = vrcp.f32 %v3311_v5  ;;  %v3591_v5 = vld [vmem:[%s5822_s16 + $0x48] sm:$0xff] }
 0x9ad   :  { %4486 = vmatpush3.msra.mxu0 %v2477_v56  ;;  %4501 = vmatprep.mubr.msk.f32.mxu0 %vm4876_vm1, %v4875_v10  ;;  %4714 = vrcp.f32 %v3324_v2  ;;  %v3592_v56 = vld [vmem:[%s5822_s16 + $0x50] sm:$0xff] }
 0x9ae   :  { %4487 = vmatprep.subr.mxu0 %v4875_v10  ;;  %4505 = vmatpush3.msra.mxu1 %v2490_v50  ;;  %v3590_v50 = vld [vmem:[%s5822_s16 + $0x40] sm:$0xff] }
 0x9af   :  { %4488 = vmatpush3.msra.mxu0 %v2476_v51  ;;  %4506 = vmatprep.subr.mxu1 %v4875_v10  ;;  %v3589_v51 = vld [vmem:[%s5822_s16 + $0x38] sm:$0xff] }
 0x9b0   :  { %4489 = vmatprep.subr.mxu0 %v4875_v10  ;;  %4507 = vmatpush3.msra.mxu1 %v2489_v52  ;;  %v3588_v52 = vld [vmem:[%s5822_s16 + $0x30] sm:$0xff] }
 0x9b1   :  { %4490 = vmatpush3.msra.mxu0 %v2475_v53  ;;  %4508 = vmatprep.subr.mxu1 %v4875_v10  ;;  %v3587_v53 = vld [vmem:[%s5822_s16 + $0x28] sm:$0xff] }
 0x9b2   :  { %4491 = vmatprep.subr.mxu0 %v4875_v10  ;;  %4509 = vmatpush3.msra.mxu1 %v2488_v57  ;;  %v3586_v57 = vld [vmem:[%s5822_s16 + $0x20] sm:$0xff] }
 0x9b3   :  { %4492 = vmatpush3.msra.mxu0 %v2474_v32  ;;  %4510 = vmatprep.subr.mxu1 %v4875_v10  ;;  %v3585_v32 = vld [vmem:[%s5822_s16 + $0x18] sm:$0xff] }
 0x9b4   :  { %4493 = vmatprep.subr.mxu0 %v4875_v10  ;;  %4511 = vmatpush3.msra.mxu1 %v2487_v58  ;;  %v3584_v58 = vld [vmem:[%s5822_s16 + $0x10] sm:$0xff] }
 0x9b5   :  { %4494 = vmatpush3.msra.mxu0 %v2473_v59  ;;  %4512 = vmatprep.subr.mxu1 %v4875_v10  ;;  %v3583_v59 = vld [vmem:[%s5822_s16 + $0x8] sm:$0xff] }
 0x9b6   :  { %4495 = vmatprep.subr.mxu0 %v4875_v10  ;;  %4513 = vmatpush3.msra.mxu1 %v2486_v60 }
 0x9b7   :  { %4496 = vmatpush3.msra.mxu0 %v2472_v54  ;;  %4514 = vmatprep.subr.mxu1 %v4875_v10 }
 0x9b8   :  { %4497 = vmatprep.subr.mxu0 %v4875_v10  ;;  %4515 = vmatpush3.msra.mxu1 %v2485_v0 }
 0x9b9   :  { %4498 = vmatpush3.msra.mxu0 %v2471_v1  ;;  %4516 = vmatprep.subr.mxu1 %v4875_v10  ;;  %v4713_v18 = vpop.eup %4712 }
 0x9ba   :  { %4499 = vmatprep.subr.mxu0 %v4875_v10  ;;  %4517 = vmatpush3.msra.mxu1 %v2484_v4  ;;  %v3333_v9 = vmul.f32 %v4713_v18, %v3331_v3  ;;  %v4715_v14 = vpop.eup %4714 }
 0x9bb   :  { %4500 = vmatpush3.msra.mxu0 %v2470_v17  ;;  %4518 = vmatprep.subr.mxu1 %v4875_v10  ;;  %v3336_v20 = vsub.f32 1.0, %v4715_v14 }
 0x9bc   :  { %4502 = vmatmul.mubr.msk.f32.vlgmr.msra.gmra.mxu0 %vm2531_vm3, %v5644_v55  ;;  %4523 = vmatprep.subr.mxu0 %v4875_v10  ;;  %v3334_v12 = vadd.f32 %v3333_v9, %v5676_v8 }
 0x9bd   :  { %4524 = vmatpush3.msra.mxu0 %v2499_v19  ;;  %4519 = vmatpush3.msra.mxu1 %v2483_v22 }
 0x9be   :  { %4525 = vmatprep.subr.mxu0 %v4875_v10  ;;  %4520 = vmatprep.mubr.msk.f32.mxu1 %vm4876_vm1, %v4875_v10  ;;  %4716 = vtanh.f32 %v3334_v12 }
 0x9bf   :  { %4526 = vmatpush3.msra.mxu0 %v2498_v11  ;;  %4539 = vmatprep.mubr.msk.f32.mxu0 %vm4876_vm1, %v4875_v10 }
 0x9c0   :  { %4527 = vmatprep.subr.mxu0 %v4875_v10  ;;  %4542 = vmatprep.subr.mxu1 %v4875_v10 }
 0x9c1   :  { %4528 = vmatpush3.msra.mxu0 %v2497_v13 }
 0x9c2   :  { %4529 = vmatprep.subr.mxu0 %v4875_v10 }
 0x9c3   :  { %4530 = vmatpush3.msra.mxu0 %v2496_v23 }
 0x9c4   :  { %4531 = vmatprep.subr.mxu0 %v4875_v10 }
 0x9c5   :  { %4532 = vmatpush3.msra.mxu0 %v2495_v26 }
 0x9c6   :  { %4533 = vmatprep.subr.mxu0 %v4875_v10 }
 0x9c7   :  { %4534 = vmatpush3.msra.mxu0 %v2494_v27 }
 0x9c8   :  { %4535 = vmatprep.subr.mxu0 %v4875_v10 }
 0x9c9   :  { %4536 = vmatpush3.msra.mxu0 %v2493_v33 }
 0x9ca   :  { %4537 = vmatprep.subr.mxu0 %v4875_v10 }
 0x9cb   :  { %4538 = vmatpush3.msra.mxu0 %v2492_v16  ;;  %v4717_v31 = vpop.eup %4716 }
 0x9cc   :  { %4561 = vmatprep.subr.mxu0 %v4875_v10  ;;  %v5696_v25 = vmul.f32 %v4717_v31, %v3336_v20 }
 0x9ce   :  { %v5699_v35 = vrot.slane %v5696_v25, 1 }
 0x9d0   :  { %4521 = vmatmul.mubr.msk.f32.vlgmr.msra.gmra.mxu1 %vm2531_vm3, %v5699_v35  ;;  %4540 = vmatmul.mubr.msk.f32.vlgmr.msra.gmra.mxu0 %vm2531_vm3, %v5699_v35 }
 0x9d1   :  { %4543 = vmatpush3.msra.mxu1 %v2508_v21  ;;  %4558 = vmatprep.mubr.msk.f32.mxu1 %vm4876_vm1, %v4875_v10 }
 0x9d2   :  { %4544 = vmatprep.subr.mxu1 %v4875_v10  ;;  %4593 = vmatprep.mubr.msk.f32.mxu0 %vm4876_vm1, %v4875_v10 }
 0x9d3   :  { %4545 = vmatpush3.msra.mxu1 %v2507_v37  ;;  %4562 = vmatpush3.msra.mxu0 %v3597_v47 }
 0x9d4   :  { %4546 = vmatprep.subr.mxu1 %v4875_v10  ;;  %4563 = vmatprep.subr.mxu0 %v4875_v10 }
 0x9d5   :  { %4547 = vmatpush3.msra.mxu1 %v2506_v38  ;;  %4564 = vmatpush3.msra.mxu0 %v3596_v48 }
 0x9d6   :  { %4548 = vmatprep.subr.mxu1 %v4875_v10  ;;  %4565 = vmatprep.subr.mxu0 %v4875_v10 }
 0x9d7   :  { %4549 = vmatpush3.msra.mxu1 %v2505_v39  ;;  %4566 = vmatpush3.msra.mxu0 %v3595_v49 }
 0x9d8   :  { %4550 = vmatprep.subr.mxu1 %v4875_v10  ;;  %4567 = vmatprep.subr.mxu0 %v4875_v10 }
 0x9d9   :  { %4551 = vmatpush3.msra.mxu1 %v2504_v42  ;;  %4568 = vmatpush3.msra.mxu0 %v3594_v24 }
 0x9da   :  { %4552 = vmatprep.subr.mxu1 %v4875_v10  ;;  %4569 = vmatprep.subr.mxu0 %v4875_v10 }
 0x9db   :  { %4553 = vmatpush3.msra.mxu1 %v2503_v44  ;;  %4570 = vmatpush3.msra.mxu0 %v3593_v40  ;;  %v3297_v44 = vrot.slane %v5644_v55, 7 }
 0x9dc   :  { %4554 = vmatprep.subr.mxu1 %v4875_v10  ;;  %4571 = vmatprep.subr.mxu0 %v4875_v10 }
 0x9dd   :  { %4555 = vmatpush3.msra.mxu1 %v2502_v45  ;;  %4572 = vmatpush3.msra.mxu0 %v3592_v56 }
 0x9de   :  { %4556 = vmatprep.subr.mxu1 %v4875_v10  ;;  %4573 = vmatprep.subr.mxu0 %v4875_v10 }
 0x9df   :  { %4557 = vmatpush3.msra.mxu1 %v2501_v46  ;;  %4574 = vmatpush3.msra.mxu0 %v3591_v5 }
 0x9e0   :  { %4559 = vmatmul.mubr.msk.f32.vlgmr.msra.gmra.mxu1 %vm2531_vm3, %v5699_v35  ;;  %4575 = vmatprep.subr.mxu0 %v4875_v10 }
 0x9e1   :  { %4576 = vmatpush3.msra.mxu0 %v3590_v50  ;;  %v3582_v50 = vld [vmem:[%s5822_s16] sm:$0xff]  ;;  %s4879_s16 = smov [#allocation11]  }
 0x9e2   :  { %4577 = vmatprep.subr.mxu0 %v4875_v10  ;;  %s3683_s29 = sshll.u32 %s4879_s16, 4  ;;  %s3684_s29 = int_to_ptr.vmem [resolvable:$true] %s3683_s29 }
 0x9e3   :  { %4578 = vmatpush3.msra.mxu0 %v3589_v51  ;;  %s4840_s12 = scalar_lea.vmem %s3684_s29, 32  ;;  %p4845_p12 = scmp.lt.s32.totalorder %s3684_s29, %s3684_s29 }
 0x9e4   :  { %4579 = vmatprep.subr.mxu0 %v4875_v10  ;;  %p4841_p11 = scmp.ne.s32.totalorder %s3684_s29, %s4840_s12  ;;  %p4846_p13 = scmp.lt.s32.totalorder %s4840_s12, %s4840_s12 }
 0x9e5   :  { %4580 = vmatpush3.msra.mxu0 %v3588_v52 }
 0x9e6   :  { %4581 = vmatprep.subr.mxu0 %v4875_v10  ;;  %p4847_p0 = por %p4846_p13, %p4845_p12 }
 0x9e7   :  { %4582 = vmatpush3.msra.mxu0 %v3587_v53 }
 0x9e8   :  { %4583 = vmatprep.subr.mxu0 %v4875_v10  ;;  %p4848_p1 = pnand %p4847_p0, %p4841_p11 }
 0x9e9   :  { %4584 = vmatpush3.msra.mxu0 %v3586_v57 }
 0x9ea   :  { %4585 = vmatprep.subr.mxu0 %v4875_v10 }
 0x9eb   :  { %4586 = vmatpush3.msra.mxu0 %v3585_v32 }
 0x9ec   :  { %4587 = vmatprep.subr.mxu0 %v4875_v10 }
 0x9ed   :  { %4588 = vmatpush3.msra.mxu0 %v3584_v58 }
 0x9ee   :  { %4589 = vmatprep.subr.mxu0 %v4875_v10 }
 0x9ef   :  { %4590 = vmatpush3.msra.mxu0 %v3583_v59  ;;  %v3808_v59 = vld [vmem:[%s5823_s17] ss:$0 sm:$0xff] }
 0x9f0   :  { %4591 = vmatprep.subr.mxu0 %v4875_v10 }
 0x9f1   :  { %4592 = vmatpush3.msra.mxu0 %v3582_v50 }
 0xa6c   :  { %v3125_v60 = vpop.f32.mrf.mxu0  ;;  %v3195_v61 = vpop.f32.mrf.mxu1 }
 0xa6d   :  { %v3126_v54 = vadd.f32 %v3125_v60, %v5584_v62  ;;  %v3196_v3 = vadd.f32 %v5596_v30, %v3195_v61 }
 0xa6e   :  { %v4465_v0 = vpop.f32.mrf.mxu0  ;;  %v4484_v1 = vpop.f32.mrf.mxu1 }
 0xa6f   :  { %v3270_v2 = vrot.slane %v3126_v54, 7  ;;  %v3280_v17 = vrot.slane %v3196_v3, 7 }
 0xa71   :  { %v3272_v4 = vadd.f32 %v3270_v2, %v5586_v63  ;;  %v3282_v18 = vadd.f32 %v3280_v17, %v5598_v7 }
 0xa73   :  { %v3799_v6 = vmul.f32 -1.442695, %v3272_v4  ;;  %v3800_v19 = vmul.f32 -1.442695, %v3282_v18 }
 0xa75   :  { %4718 = vpow2.f32 %v3799_v6 }
 0xa76   :  { %4720 = vpow2.f32 %v3800_v19 }
 0xa7c   :  { %v3265_v22 = vpop.f32.mrf.mxu0 }
 0xa7d   :  { %v3266_v12 = vadd.f32 %v5617_v28, %v3265_v22 }
 0xa7e   :  { %v4503_v9 = vpop.f32.mrf.mxu0 }
 0xa7f   :  { %v3290_v23 = vrot.slane %v3266_v12, 7 }
 0xa82   :  { %v4719_v10 = vpop.eup %4718 }
 0xa83   :  { %v3276_v11 = vadd.f32 1.0, %v4719_v10  ;;  %v4721_v62 = vpop.eup %4720 }
 0xa84   :  { %v3286_v13 = vadd.f32 1.0, %v4721_v62 }
 0xa85   :  { %4722 = vrcp.f32 %v3276_v11 }
 0xa86   :  { %4724 = vrcp.f32 %v3286_v13 }
 0xa90   :  { %v3408_v30 = vpop.f32.mrf.mxu1  ;;  %v3478_v26 = vpop.f32.mrf.mxu0 }
 0xa91   :  { %v3409_v27 = vadd.f32 %v3408_v30, %v5605_v15  ;;  %v3479_v21 = vadd.f32 %v5631_v36, %v3478_v26 }
 0xa92   :  { %v4723_v63 = vpop.eup %4722  ;;  %v4522_v7 = vpop.f32.mrf.mxu1 }
 0xa93   :  { %v3292_v33 = vmul.f32 %v4723_v63, %v3290_v23  ;;  %v4541_v14 = vpop.f32.mrf.mxu0  ;;  %v3552_v16 = vadd.f32 %v3409_v27, %v5622_v29  ;;  %v3559_v28 = vadd.f32 %v3479_v21, %v5637_v41  ;;  %v4725_v38 = vpop.eup %4724 }
 0xa94   :  { %v3295_v42 = vsub.f32 1.0, %v4725_v38  ;;  %v3299_v47 = vmul.f32 %v4725_v38, %v3297_v44 }
 0xa95   :  { %v3293_v20 = vadd.f32 %v3292_v33, %v5625_v34  ;;  %v3806_v31 = vmul.f32 -1.442695, %v3552_v16  ;;  %v3807_v37 = vmul.f32 -1.442695, %v3559_v28 }
 0xa97   :  { %4726 = vtanh.f32 %v3293_v20 }
 0xa98   :  { %4728 = vpow2.f32 %v3806_v31 }
 0xa99   :  { %4730 = vpow2.f32 %v3807_v37 }
 0xaa0   :  { %v3548_v39 = vpop.f32.mrf.mxu1 }
 0xaa1   :  { %v3549_v24 = vadd.f32 %v5661_v43, %v3548_v39 }
 0xaa2   :  { %v4560_v15 = vpop.f32.mrf.mxu1 }
 0xaa4   :  { %v4727_v45 = vpop.eup %4726 }
 0xaa5   :  { %v4729_v46 = vpop.eup %4728  ;;  %v3296_v29 = vmul.f32 %v4727_v45, %v3295_v42 }
 0xaa6   :  { %v3556_v34 = vadd.f32 1.0, %v4729_v46  ;;  %v4731_v41 = vpop.eup %4730 }
 0xaa7   :  { %v3300_v48 = vadd.f32 %v3299_v47, %v3296_v29  ;;  %v3563_v49 = vadd.f32 1.0, %v4731_v41 }
 0xaa8   :  { %4732 = vrcp.f32 %v3556_v34 }
 0xaa9   :  { %v3575_v36 = vsel %vm3574_vm4, %v5644_v55, %v3300_v48  ;;  %4734 = vrcp.f32 %v3563_v49 }
 0xab5   :  { %v4733_v40 = vpop.eup %4732 }
 0xab6   :  { %v3566_v56 = vmul.f32 %v4733_v40, %v3549_v24  ;;  %v4735_v51 = vpop.eup %4734 }
 0xab7   :  { %v3569_v52 = vsub.f32 1.0, %v4735_v51  ;;  %v3572_v55 = vmul.f32 %v4735_v51, %v5699_v35 }
 0xab8   :  { %v3567_v5 = vadd.f32 %v3566_v56, %v5676_v8 }
 0xaba   :  { %4736 = vtanh.f32 %v3567_v5 }
 0xac7   :  { %v4737_v53 = vpop.eup %4736 }
 0xac8   :  { %v3570_v57 = vmul.f32 %v4737_v53, %v3569_v52 }
 0xaca   :  { %v3573_v32 = vadd.f32 %v3572_v55, %v3570_v57 }
 0xacc   :  { %v3576_v43 = vsel %vm3574_vm4, %v3573_v32, %v5696_v25 }
 0xacd   :  { %3578 = vrot.lane.b32.xlu0 %v3576_v43, %s4878_s6 }
 0xb3f   :  { %v3579_v58 = vpop.permute.xlu0 %3578 }
 0xb40   :  { %v3581_v8 = vsel %vm2531_vm3, %v3575_v36, %v3579_v58 }
 0xb41   :  { %4594 = vmatmul.mubr.f32.vlgmr.msra.gmra.mxu0 %v3581_v8 }
 0xc01   :  { %v3671_v60 = vpop.f32.mrf.mxu0 }
 0xc02   :  { %v3672_v61 = vadd.f32 %v3808_v59, %v3671_v60 }
 0xc03   :  { %v4595_v35 = vpop.f32.mrf.mxu0 }
 0xc04   :  { %3676 = vst.msk [vmem:[#allocation11] sm:$0x3] %vm3675_vm5, %v3672_v61 }
 0xc05   :  { %4851 = shalt.err (!%p4848_p1)
}
 0xc06   :  { %3686 = dma.vmem_to_hbm [thread:$0]  %s3684_s29, 32, %s5824_s18, [#allocation4]  }
 0xc07   :  { %4866 = dma.done.wait [#allocation4], 32  }
 0xc08   :  { %4867 = vsyncadd [#allocation4], 4294967264 }
 0xc09   :  { %3690 = vsyncpa [#allocation3], 1 }
 0xc0a   :  { %3691 = vsyncpa [#allocation6], 1 }
 0xc0b   :  { %3692 = vsyncpa [#allocation9], 1 }
 0xc0c   :  { %3693 = vsyncpa [#allocation4], 1 }

</bundles_post_ra>
